<compile_context>
chip_gen: v6e
topology: v6e:2x2x1
jax: 0.10.0
libtpu: 0.0.40
codegen_flags: <defaults>
</compile_context>

<pallas_src>
import functools

import jax
import jax.numpy as jnp
from jax.experimental import pallas as pl
from jax.experimental.pallas import tpu as pltpu


# ----------------------------------------------------------------------------
# Pallas kernel
# ----------------------------------------------------------------------------
def _encoder_kernel(len_ref,                                   # scalar-prefetch (B,) int32 SMEM
                    x_ref, gf_ref, gg_ref, eps_ref,            # per-batch tensors
                    pre_w_ref, pre_b_ref,
                    inw_f_ref, inw_g_ref, inb_f_ref, inb_g_ref,
                    rs_res_w_ref, rs_res_b_ref, rs_skip_w_ref, rs_skip_b_ref,
                    proj_w_ref, proj_b_ref,
                    out_ref,                                   # packed (T, 3*Cout)
                    h_pad_ref,                                 # VMEM scratch (T + 2*pad, H) f32
                    *, T, H, Cout, K, dil_rate, n_layers, pad):
    b = pl.program_id(0)
    length = len_ref[b]

    # sequence mask (commons.sequence_mask): (T, 1) float
    t_idx = jax.lax.broadcasted_iota(jnp.int32, (T, 1), 0)
    mask = (t_idx < length).astype(jnp.float32)

    # pre: 1x1 conv == channel matmul (bf16 operands, f32 accumulate)
    h = (jnp.dot(x_ref[...], pre_w_ref[...], preferred_element_type=jnp.float32)
         + pre_b_ref[...]) * mask                                           # (T, H) f32

    # zero halos once; only the center [pad, pad+T) is rewritten each layer
    h_pad_ref[...] = jnp.zeros_like(h_pad_ref)

    center = (K - 1) // 2
    output = jnp.zeros((T, H), jnp.float32)

    for i in range(n_layers):
        d = dil_rate ** i
        h_pad_ref[pad:pad + T, :] = h

        # gather the K dilated taps as static slices of the padded scratch and
        # fuse them into one (T, K*H) operand -> single MXU contraction per gate
        taps = [h_pad_ref[pad + (k - center) * d: pad + (k - center) * d + T, :]
                for k in range(K)]
        slab = jnp.concatenate(taps, axis=1).astype(jnp.bfloat16)           # (T, K*H)

        x_f = (jnp.dot(slab, inw_f_ref[i], preferred_element_type=jnp.float32)
               + inb_f_ref[i:i + 1, :] + gf_ref[i:i + 1, :])                # (T, H)
        x_g = (jnp.dot(slab, inw_g_ref[i], preferred_element_type=jnp.float32)
               + inb_g_ref[i:i + 1, :] + gg_ref[i:i + 1, :])                # (T, H)

        # fused_add_tanh_sigmoid_multiply (f32 non-linearities)
        acts = jnp.tanh(x_f) * jax.nn.sigmoid(x_g)                          # (T, H) f32
        acts_b = acts.astype(jnp.bfloat16)

        # skip path (last layer's single H-wide output also lands here)
        output = output + (jnp.dot(acts_b, rs_skip_w_ref[i],
                                   preferred_element_type=jnp.float32)
                           + rs_skip_b_ref[i:i + 1, :])
        if i < n_layers - 1:
            res = (jnp.dot(acts_b, rs_res_w_ref[i],
                           preferred_element_type=jnp.float32)
                   + rs_res_b_ref[i:i + 1, :])
            h = (h + res) * mask

    wn_out = (output * mask).astype(jnp.bfloat16)

    # proj: 1x1 conv -> stats, split into (m, logs)
    stats = (jnp.dot(wn_out, proj_w_ref[...], preferred_element_type=jnp.float32)
             + proj_b_ref[...]) * mask                                      # (T, 2*Cout)
    m = stats[:, :Cout]
    logs = stats[:, Cout:]
    z = (m + eps_ref[...] * jnp.exp(logs)) * mask

    # single lane-dense packed store: [z | m | logs]
    out_ref[...] = jnp.concatenate([z, m, logs], axis=1).astype(out_ref.dtype)


# ----------------------------------------------------------------------------
# Wrapper (PyTorch NCT layout in / out)
# ----------------------------------------------------------------------------
def encoder_forward(x, x_lengths, g, eps, params, *, hidden_channels,
                    out_channels, kernel_size, dilation_rate, n_layers,
                    gin_channels):
    B, Cin, T = x.shape
    H, Cout, K, L = hidden_channels, out_channels, kernel_size, n_layers
    pad = ((K - 1) // 2) * dilation_rate ** (L - 1)     # max dilated halo

    # kernel-layout inputs: (B, T, C)
    x_k = jnp.transpose(x, (0, 2, 1)).astype(jnp.bfloat16)
    eps_k = jnp.transpose(eps, (0, 2, 1)).astype(jnp.float32)

    # global conditioning precomputed in XLA (M=1 matmul is a waste of an MXU pass)
    if gin_channels > 0 and g is not None:
        gc = (jnp.einsum('bg,og->bo', g[:, :, 0], params['cond_w'][:, :, 0])
              + params['cond_b'][None, :])                                  # (B, 2*H*L)
    else:
        gc = jnp.zeros((B, 2 * H * L), jnp.float32)
    gc = gc.reshape(B, L, 2 * H).astype(jnp.float32)
    g_f = gc[:, :, :H]                                                      # (B, L, H)
    g_g = gc[:, :, H:]                                                      # (B, L, H)

    # re-layout / split parameters for (T, C) matmuls; cast MXU operands to bf16
    pre_w = jnp.transpose(params['pre_w'][:, :, 0]).astype(jnp.bfloat16)    # (Cin, H)
    pre_b = params['pre_b'].reshape(1, H).astype(jnp.float32)

    in_w = jnp.transpose(params['in_w'], (0, 3, 2, 1)).reshape(L, K * H, 2 * H)
    inw_f = in_w[:, :, :H].astype(jnp.bfloat16)                             # (L, K*H, H)
    inw_g = in_w[:, :, H:].astype(jnp.bfloat16)                             # (L, K*H, H)
    inb_f = params['in_b'][:, :H].astype(jnp.float32)                       # (L, H)
    inb_g = params['in_b'][:, H:].astype(jnp.float32)                       # (L, H)

    rs_w3 = params['rs_w'][:, :, :, 0]                                      # (L, 2H, H)
    rs_res_w = jnp.transpose(rs_w3[:, :H, :], (0, 2, 1)).astype(jnp.bfloat16)   # (L, H, H)
    # last layer only outputs H channels (goes to the skip/output path)
    rs_skip_src = jnp.concatenate([rs_w3[:L - 1, H:, :], rs_w3[L - 1:, :H, :]], axis=0)
    rs_skip_w = jnp.transpose(rs_skip_src, (0, 2, 1)).astype(jnp.bfloat16)      # (L, H, H)
    rs_res_b = params['rs_b'][:, :H].astype(jnp.float32)                    # (L, H)
    rs_skip_b = jnp.concatenate([params['rs_b'][:L - 1, H:],
                                 params['rs_b'][L - 1:, :H]], axis=0).astype(jnp.float32)

    proj_w = jnp.transpose(params['proj_w'][:, :, 0]).astype(jnp.bfloat16)  # (H, 2*Cout)
    proj_b = params['proj_b'].reshape(1, 2 * Cout).astype(jnp.float32)

    kernel = functools.partial(_encoder_kernel, T=T, H=H, Cout=Cout, K=K,
                               dil_rate=dilation_rate, n_layers=L, pad=pad)

    grid_spec = pltpu.PrefetchScalarGridSpec(
        num_scalar_prefetch=1,
        grid=(B,),
        in_specs=[
            pl.BlockSpec((None, T, Cin), lambda b, lens: (b, 0, 0)),      # x
            pl.BlockSpec((None, L, H), lambda b, lens: (b, 0, 0)),        # g_f
            pl.BlockSpec((None, L, H), lambda b, lens: (b, 0, 0)),        # g_g
            pl.BlockSpec((None, T, Cout), lambda b, lens: (b, 0, 0)),     # eps
            pl.BlockSpec((Cin, H), lambda b, lens: (0, 0)),               # pre_w
            pl.BlockSpec((1, H), lambda b, lens: (0, 0)),                 # pre_b
            pl.BlockSpec((L, K * H, H), lambda b, lens: (0, 0, 0)),       # inw_f
            pl.BlockSpec((L, K * H, H), lambda b, lens: (0, 0, 0)),       # inw_g
            pl.BlockSpec((L, H), lambda b, lens: (0, 0)),                 # inb_f
            pl.BlockSpec((L, H), lambda b, lens: (0, 0)),                 # inb_g
            pl.BlockSpec((L, H, H), lambda b, lens: (0, 0, 0)),           # rs_res_w
            pl.BlockSpec((L, H), lambda b, lens: (0, 0)),                 # rs_res_b
            pl.BlockSpec((L, H, H), lambda b, lens: (0, 0, 0)),           # rs_skip_w
            pl.BlockSpec((L, H), lambda b, lens: (0, 0)),                 # rs_skip_b
            pl.BlockSpec((H, 2 * Cout), lambda b, lens: (0, 0)),          # proj_w
            pl.BlockSpec((1, 2 * Cout), lambda b, lens: (0, 0)),          # proj_b
        ],
        out_specs=pl.BlockSpec((None, T, 3 * Cout), lambda b, lens: (b, 0, 0)),
        scratch_shapes=[pltpu.VMEM((T + 2 * pad, H), jnp.float32)],
    )

    out = pl.pallas_call(
        kernel,
        grid_spec=grid_spec,
        out_shape=jax.ShapeDtypeStruct((B, T, 3 * Cout), jnp.float32),
        compiler_params=pltpu.CompilerParams(dimension_semantics=("parallel",)),
    )(x_lengths.astype(jnp.int32), x_k, g_f, g_g, eps_k,
      pre_w, pre_b, inw_f, inw_g, inb_f, inb_g,
      rs_res_w, rs_res_b, rs_skip_w, rs_skip_b, proj_w, proj_b)

    # back to PyTorch NCT layout; mask is pure function of x_lengths -> wrapper
    z = jnp.transpose(out[:, :, :Cout], (0, 2, 1)).astype(x.dtype)
    m = jnp.transpose(out[:, :, Cout:2 * Cout], (0, 2, 1)).astype(x.dtype)
    logs = jnp.transpose(out[:, :, 2 * Cout:], (0, 2, 1)).astype(x.dtype)
    mask = (jnp.arange(T)[None, :] < x_lengths[:, None]).astype(x.dtype)[:, None, :]
    return z, m, logs, mask


# ----------------------------------------------------------------------------
# Pure-JAX reference (for correctness check)
# ----------------------------------------------------------------------------
def _conv1d(x, w, b, dilation=1, padding=0):
    y = jax.lax.conv_general_dilated(
        x, w, window_strides=(1,), padding=[(padding, padding)],
        rhs_dilation=(dilation,), dimension_numbers=('NCH', 'OIH', 'NCH'))
    return y + b[None, :, None]


def encoder_reference(x, x_lengths, g, eps, params, *, hidden_channels,
                      out_channels, kernel_size, dilation_rate, n_layers,
                      gin_channels):
    B, Cin, T = x.shape
    H, Cout, K, L = hidden_channels, out_channels, kernel_size, n_layers
    mask = (jnp.arange(T)[None, :] < x_lengths[:, None]).astype(x.dtype)[:, None, :]
    h = _conv1d(x, params['pre_w'], params['pre_b']) * mask
    gc = None
    if gin_channels > 0 and g is not None:
        gc = _conv1d(g, params['cond_w'], params['cond_b'])
    output = jnp.zeros_like(h)
    for i in range(L):
        d = dilation_rate ** i
        p = (K * d - d) // 2
        x_in = _conv1d(h, params['in_w'][i], params['in_b'][i],
                       dilation=d, padding=p)
        if gc is not None:
            x_in = x_in + gc[:, i * 2 * H:(i + 1) * 2 * H, :]
        acts = jnp.tanh(x_in[:, :H]) * jax.nn.sigmoid(x_in[:, H:])
        rs = _conv1d(acts, params['rs_w'][i], params['rs_b'][i])   # rs_w[i]: (2H, H, 1)
        if i < L - 1:
            h = (h + rs[:, :H]) * mask
            output = output + rs[:, H:]
        else:
            output = output + rs[:, :H]
    wn_out = output * mask
    stats = _conv1d(wn_out, params['proj_w'], params['proj_b']) * mask
    m, logs = stats[:, :Cout], stats[:, Cout:]
    z = (m + eps * jnp.exp(logs)) * mask
    return z, m, logs, mask


# ----------------------------------------------------------------------------
# Main
# ----------------------------------------------------------------------------
if __name__ == "__main__":
    # module config (small)
    in_channels, out_channels, hidden_channels = 8, 4, 32
    kernel_size, dilation_rate, n_layers, gin_channels = 5, 2, 3, 16
    B, T = 2, 16
    H, Cout, K, L, Gin = hidden_channels, out_channels, kernel_size, n_layers, gin_channels

    key = jax.random.PRNGKey(0)
    ks = jax.random.split(key, 16)

    # deterministic synthetic parameters (PyTorch Conv1d weight layouts, incl. kernel dim)
    params = {
        'pre_w': 0.1 * jax.random.normal(ks[0], (H, in_channels, 1), jnp.float32),
        'pre_b': 0.1 * jax.random.normal(ks[1], (H,), jnp.float32),
        'in_w': 0.1 * jax.random.normal(ks[2], (L, 2 * H, H, K), jnp.float32),
        'in_b': 0.1 * jax.random.normal(ks[3], (L, 2 * H), jnp.float32),
        'cond_w': 0.1 * jax.random.normal(ks[4], (2 * H * L, Gin, 1), jnp.float32),
        'cond_b': 0.1 * jax.random.normal(ks[5], (2 * H * L,), jnp.float32),
        'rs_w': 0.1 * jax.random.normal(ks[6], (L, 2 * H, H, 1), jnp.float32),
        'rs_b': 0.1 * jax.random.normal(ks[7], (L, 2 * H), jnp.float32),
        'proj_w': 0.1 * jax.random.normal(ks[8], (2 * Cout, H, 1), jnp.float32),
        'proj_b': 0.1 * jax.random.normal(ks[9], (2 * Cout,), jnp.float32),
    }
    # last WN layer has only `hidden_channels` res/skip outputs; zero-pad the rest
    params['rs_w'] = params['rs_w'].at[L - 1, H:].set(0.0)
    params['rs_b'] = params['rs_b'].at[L - 1, H:].set(0.0)

    # inputs
    x = jax.random.normal(ks[10], (B, in_channels, T), jnp.float32)
    x_lengths = jnp.array([T, 11], jnp.int32)
    g = jax.random.normal(ks[11], (B, gin_channels, 1), jnp.float32)
    # noise for the reparameterized sample (torch.randn_like(m)); passed in so
    # kernel and reference use identical randoms.
    eps = jax.random.normal(ks[12], (B, out_channels, T), jnp.float32)

    cfg = dict(hidden_channels=H, out_channels=Cout, kernel_size=K,
               dilation_rate=dilation_rate, n_layers=L, gin_channels=gin_channels)

    z, m, logs, mask = encoder_forward(x, x_lengths, g, eps, params, **cfg)
    jax.block_until_ready((z, m, logs, mask))

    z_r, m_r, logs_r, mask_r = encoder_reference(x, x_lengths, g, eps, params, **cfg)
    # tolerance accounts for bf16 MXU operands (f32 accumulation / non-linearities)
    for got, ref in ((z, z_r), (m, m_r), (logs, logs_r), (mask, mask_r)):
        assert got.shape == ref.shape, (got.shape, ref.shape)
        assert jnp.allclose(got, ref, rtol=3e-2, atol=2e-2), float(
            jnp.max(jnp.abs(got - ref)))

    print("KERNEL_OK")
</pallas_src>

<mosaic_0001>
module attributes {stable_mosaic.version = 11 : i64} {
  func.func @_encoder_kernel(%arg0: i32, %arg1: memref<2xi32, #tpu.memory_space<smem>>, %arg2: memref<1x16x8xbf16, #tpu.memory_space<vmem>>, %arg3: memref<1x3x32xf32, #tpu.memory_space<vmem>>, %arg4: memref<1x3x32xf32, #tpu.memory_space<vmem>>, %arg5: memref<1x16x4xf32, #tpu.memory_space<vmem>>, %arg6: memref<8x32xbf16, #tpu.memory_space<vmem>>, %arg7: memref<1x32xf32, #tpu.memory_space<vmem>>, %arg8: memref<3x160x32xbf16, #tpu.memory_space<vmem>>, %arg9: memref<3x160x32xbf16, #tpu.memory_space<vmem>>, %arg10: memref<3x32xf32, #tpu.memory_space<vmem>>, %arg11: memref<3x32xf32, #tpu.memory_space<vmem>>, %arg12: memref<3x32x32xbf16, #tpu.memory_space<vmem>>, %arg13: memref<3x32xf32, #tpu.memory_space<vmem>>, %arg14: memref<3x32x32xbf16, #tpu.memory_space<vmem>>, %arg15: memref<3x32xf32, #tpu.memory_space<vmem>>, %arg16: memref<32x8xbf16, #tpu.memory_space<vmem>>, %arg17: memref<1x8xf32, #tpu.memory_space<vmem>>, %arg18: memref<1x16x12xf32, #tpu.memory_space<vmem>>, %arg19: memref<32x32xf32, #tpu.memory_space<vmem>>) attributes {dimension_semantics = [#tpu.dimension_semantics<parallel>], iteration_bounds = array<i64: 2>, scalar_prefetch = 1 : i64, scratch_operands = 1 : i64, tpu.core_type = #tpu.core_type<tc>, window_params = [{transform_indices = @transform_0, window_bounds = array<i64: 1, 16, 8>}, {transform_indices = @transform_1, window_bounds = array<i64: 1, 3, 32>}, {transform_indices = @transform_2, window_bounds = array<i64: 1, 3, 32>}, {transform_indices = @transform_3, window_bounds = array<i64: 1, 16, 4>}, {pipeline_mode = #tpu.pipeline_mode<synchronous>, transform_indices = @transform_4, window_bounds = array<i64: 8, 32>}, {pipeline_mode = #tpu.pipeline_mode<synchronous>, transform_indices = @transform_5, window_bounds = array<i64: 1, 32>}, {pipeline_mode = #tpu.pipeline_mode<synchronous>, transform_indices = @transform_6, window_bounds = array<i64: 3, 160, 32>}, {pipeline_mode = #tpu.pipeline_mode<synchronous>, transform_indices = @transform_7, window_bounds = array<i64: 3, 160, 32>}, {pipeline_mode = #tpu.pipeline_mode<synchronous>, transform_indices = @transform_8, window_bounds = array<i64: 3, 32>}, {pipeline_mode = #tpu.pipeline_mode<synchronous>, transform_indices = @transform_9, window_bounds = array<i64: 3, 32>}, {pipeline_mode = #tpu.pipeline_mode<synchronous>, transform_indices = @transform_10, window_bounds = array<i64: 3, 32, 32>}, {pipeline_mode = #tpu.pipeline_mode<synchronous>, transform_indices = @transform_11, window_bounds = array<i64: 3, 32>}, {pipeline_mode = #tpu.pipeline_mode<synchronous>, transform_indices = @transform_12, window_bounds = array<i64: 3, 32, 32>}, {pipeline_mode = #tpu.pipeline_mode<synchronous>, transform_indices = @transform_13, window_bounds = array<i64: 3, 32>}, {pipeline_mode = #tpu.pipeline_mode<synchronous>, transform_indices = @transform_14, window_bounds = array<i64: 32, 8>}, {pipeline_mode = #tpu.pipeline_mode<synchronous>, transform_indices = @transform_15, window_bounds = array<i64: 1, 8>}, {transform_indices = @transform_16, window_bounds = array<i64: 1, 16, 12>}]} {
    %0 = arith.index_cast %arg0 : i32 to index
    %1 = memref.load %arg1[%0] : memref<2xi32, #tpu.memory_space<smem>>
    %2 = tpu.iota {dimensions = array<i32: 0>} : vector<16x1xi32>
    %3 = vector.broadcast %1 : i32 to vector<16x1xi32>
    %4 = arith.cmpi slt, %2, %3 : vector<16x1xi32>
    %5 = arith.extui %4 : vector<16x1xi1> to vector<16x1xi32>
    %6 = arith.sitofp %5 : vector<16x1xi32> to vector<16x1xf32>
    %c0 = arith.constant 0 : index
    %c0_0 = arith.constant 0 : index
    %c0_1 = arith.constant 0 : index
    %7 = vector.load %arg2[%c0, %c0_0, %c0_1] : memref<1x16x8xbf16, #tpu.memory_space<vmem>>, vector<1x16x8xbf16>
    %8 = vector.shape_cast %7 : vector<1x16x8xbf16> to vector<16x8xbf16>
    %c0_2 = arith.constant 0 : index
    %c0_3 = arith.constant 0 : index
    %9 = vector.load %arg6[%c0_2, %c0_3] : memref<8x32xbf16, #tpu.memory_space<vmem>>, vector<8x32xbf16>
    %cst = arith.constant dense<0.000000e+00> : vector<16x32xf32>
    %10 = tpu.matmul %8, %9, %cst {dimension_numbers = #tpu.dot_dimension_numbers<[1], [0], [0], [1], [0, 0, 1, 1], [], []>} : vector<16x8xbf16>, vector<8x32xbf16>, vector<16x32xf32> -> vector<16x32xf32>
    %c0_4 = arith.constant 0 : index
    %c0_5 = arith.constant 0 : index
    %11 = vector.load %arg7[%c0_4, %c0_5] : memref<1x32xf32, #tpu.memory_space<vmem>>, vector<1x32xf32>
    %12 = vector.broadcast %11 : vector<1x32xf32> to vector<16x32xf32>
    %13 = arith.addf %10, %12 : vector<16x32xf32>
    %14 = vector.broadcast %6 : vector<16x1xf32> to vector<16x32xf32>
    %15 = arith.mulf %13, %14 : vector<16x32xf32>
    %cst_6 = arith.constant 0.000000e+00 : f32
    %16 = vector.broadcast %cst_6 : f32 to vector<32x32xf32>
    %c0_7 = arith.constant 0 : index
    %c0_8 = arith.constant 0 : index
    %17 = vector.load %arg19[%c0_7, %c0_8] : memref<32x32xf32, #tpu.memory_space<vmem>>, vector<32x32xf32>
    tpu.vector_store %arg19[%c0_7, %c0_8], %16 {strides = array<i32>} : memref<32x32xf32, #tpu.memory_space<vmem>>, vector<32x32xf32>,
    %cst_9 = arith.constant 0.000000e+00 : f32
    %18 = vector.broadcast %cst_9 : f32 to vector<16x32xf32>
    %c8 = arith.constant 8 : index
    %c0_10 = arith.constant 0 : index
    %19 = vector.load %arg19[%c8, %c0_10] : memref<32x32xf32, #tpu.memory_space<vmem>>, vector<16x32xf32>
    tpu.vector_store %arg19[%c8, %c0_10], %15 {strides = array<i32>} : memref<32x32xf32, #tpu.memory_space<vmem>>, vector<16x32xf32>,
    %c6 = arith.constant 6 : index
    %c0_11 = arith.constant 0 : index
    %20 = vector.load %arg19[%c6, %c0_11] : memref<32x32xf32, #tpu.memory_space<vmem>>, vector<16x32xf32>
    %c7 = arith.constant 7 : index
    %c0_12 = arith.constant 0 : index
    %21 = vector.load %arg19[%c7, %c0_12] : memref<32x32xf32, #tpu.memory_space<vmem>>, vector<16x32xf32>
    %c8_13 = arith.constant 8 : index
    %c0_14 = arith.constant 0 : index
    %22 = vector.load %arg19[%c8_13, %c0_14] : memref<32x32xf32, #tpu.memory_space<vmem>>, vector<16x32xf32>
    %c9 = arith.constant 9 : index
    %c0_15 = arith.constant 0 : index
    %23 = vector.load %arg19[%c9, %c0_15] : memref<32x32xf32, #tpu.memory_space<vmem>>, vector<16x32xf32>
    %c10 = arith.constant 10 : index
    %c0_16 = arith.constant 0 : index
    %24 = vector.load %arg19[%c10, %c0_16] : memref<32x32xf32, #tpu.memory_space<vmem>>, vector<16x32xf32>
    %25 = tpu.concatenate %20, %21, %22, %23, %24 in 1 : vector<16x32xf32>, vector<16x32xf32>, vector<16x32xf32>, vector<16x32xf32>, vector<16x32xf32> -> vector<16x160xf32>
    %26 = arith.truncf %25 : vector<16x160xf32> to vector<16x160xbf16>
    %c0_17 = arith.constant 0 : index
    %c0_18 = arith.constant 0 : index
    %c0_19 = arith.constant 0 : index
    %27 = vector.load %arg8[%c0_17, %c0_18, %c0_19] : memref<3x160x32xbf16, #tpu.memory_space<vmem>>, vector<1x160x32xbf16>
    %28 = vector.shape_cast %27 : vector<1x160x32xbf16> to vector<160x32xbf16>
    %cst_20 = arith.constant dense<0.000000e+00> : vector<16x32xf32>
    %29 = tpu.matmul %26, %28, %cst_20 {dimension_numbers = #tpu.dot_dimension_numbers<[1], [0], [0], [1], [0, 0, 1, 1], [], []>} : vector<16x160xbf16>, vector<160x32xbf16>, vector<16x32xf32> -> vector<16x32xf32>
    %c0_21 = arith.constant 0 : index
    %c0_22 = arith.constant 0 : index
    %30 = vector.load %arg10[%c0_21, %c0_22] : memref<3x32xf32, #tpu.memory_space<vmem>>, vector<1x32xf32>
    %31 = vector.broadcast %30 : vector<1x32xf32> to vector<16x32xf32>
    %32 = arith.addf %29, %31 : vector<16x32xf32>
    %c0_23 = arith.constant 0 : index
    %c0_24 = arith.constant 0 : index
    %c0_25 = arith.constant 0 : index
    %33 = vector.load %arg3[%c0_23, %c0_24, %c0_25] : memref<1x3x32xf32, #tpu.memory_space<vmem>>, vector<1x1x32xf32>
    %34 = vector.shape_cast %33 : vector<1x1x32xf32> to vector<1x32xf32>
    %35 = vector.broadcast %34 : vector<1x32xf32> to vector<16x32xf32>
    %36 = arith.addf %32, %35 : vector<16x32xf32>
    %c0_26 = arith.constant 0 : index
    %c0_27 = arith.constant 0 : index
    %c0_28 = arith.constant 0 : index
    %37 = vector.load %arg9[%c0_26, %c0_27, %c0_28] : memref<3x160x32xbf16, #tpu.memory_space<vmem>>, vector<1x160x32xbf16>
    %38 = vector.shape_cast %37 : vector<1x160x32xbf16> to vector<160x32xbf16>
    %cst_29 = arith.constant dense<0.000000e+00> : vector<16x32xf32>
    %39 = tpu.matmul %26, %38, %cst_29 {dimension_numbers = #tpu.dot_dimension_numbers<[1], [0], [0], [1], [0, 0, 1, 1], [], []>} : vector<16x160xbf16>, vector<160x32xbf16>, vector<16x32xf32> -> vector<16x32xf32>
    %c0_30 = arith.constant 0 : index
    %c0_31 = arith.constant 0 : index
    %40 = vector.load %arg11[%c0_30, %c0_31] : memref<3x32xf32, #tpu.memory_space<vmem>>, vector<1x32xf32>
    %41 = vector.broadcast %40 : vector<1x32xf32> to vector<16x32xf32>
    %42 = arith.addf %39, %41 : vector<16x32xf32>
    %c0_32 = arith.constant 0 : index
    %c0_33 = arith.constant 0 : index
    %c0_34 = arith.constant 0 : index
    %43 = vector.load %arg4[%c0_32, %c0_33, %c0_34] : memref<1x3x32xf32, #tpu.memory_space<vmem>>, vector<1x1x32xf32>
    %44 = vector.shape_cast %43 : vector<1x1x32xf32> to vector<1x32xf32>
    %45 = vector.broadcast %44 : vector<1x32xf32> to vector<16x32xf32>
    %46 = arith.addf %42, %45 : vector<16x32xf32>
    %47 = math.tanh %36 : vector<16x32xf32>
    %48 = arith.negf %46 : vector<16x32xf32>
    %49 = math.exp %48 : vector<16x32xf32>
    %cst_35 = arith.constant 1.000000e+00 : f32
    %50 = vector.broadcast %cst_35 : f32 to vector<16x32xf32>
    %51 = arith.addf %50, %49 : vector<16x32xf32>
    %52 = arith.divf %50, %51 : vector<16x32xf32>
    %53 = arith.mulf %47, %52 : vector<16x32xf32>
    %54 = arith.truncf %53 : vector<16x32xf32> to vector<16x32xbf16>
    %c0_36 = arith.constant 0 : index
    %c0_37 = arith.constant 0 : index
    %c0_38 = arith.constant 0 : index
    %55 = vector.load %arg14[%c0_36, %c0_37, %c0_38] : memref<3x32x32xbf16, #tpu.memory_space<vmem>>, vector<1x32x32xbf16>
    %56 = vector.shape_cast %55 : vector<1x32x32xbf16> to vector<32x32xbf16>
    %cst_39 = arith.constant dense<0.000000e+00> : vector<16x32xf32>
    %57 = tpu.matmul %54, %56, %cst_39 {dimension_numbers = #tpu.dot_dimension_numbers<[1], [0], [0], [1], [0, 0, 1, 1], [], []>} : vector<16x32xbf16>, vector<32x32xbf16>, vector<16x32xf32> -> vector<16x32xf32>
    %c0_40 = arith.constant 0 : index
    %c0_41 = arith.constant 0 : index
    %58 = vector.load %arg15[%c0_40, %c0_41] : memref<3x32xf32, #tpu.memory_space<vmem>>, vector<1x32xf32>
    %59 = vector.broadcast %58 : vector<1x32xf32> to vector<16x32xf32>
    %60 = arith.addf %57, %59 : vector<16x32xf32>
    %61 = arith.addf %18, %60 : vector<16x32xf32>
    %c0_42 = arith.constant 0 : index
    %c0_43 = arith.constant 0 : index
    %c0_44 = arith.constant 0 : index
    %62 = vector.load %arg12[%c0_42, %c0_43, %c0_44] : memref<3x32x32xbf16, #tpu.memory_space<vmem>>, vector<1x32x32xbf16>
    %63 = vector.shape_cast %62 : vector<1x32x32xbf16> to vector<32x32xbf16>
    %cst_45 = arith.constant dense<0.000000e+00> : vector<16x32xf32>
    %64 = tpu.matmul %54, %63, %cst_45 {dimension_numbers = #tpu.dot_dimension_numbers<[1], [0], [0], [1], [0, 0, 1, 1], [], []>} : vector<16x32xbf16>, vector<32x32xbf16>, vector<16x32xf32> -> vector<16x32xf32>
    %c0_46 = arith.constant 0 : index
    %c0_47 = arith.constant 0 : index
    %65 = vector.load %arg13[%c0_46, %c0_47] : memref<3x32xf32, #tpu.memory_space<vmem>>, vector<1x32xf32>
    %66 = vector.broadcast %65 : vector<1x32xf32> to vector<16x32xf32>
    %67 = arith.addf %64, %66 : vector<16x32xf32>
    %68 = arith.addf %15, %67 : vector<16x32xf32>
    %69 = vector.broadcast %6 : vector<16x1xf32> to vector<16x32xf32>
    %70 = arith.mulf %68, %69 : vector<16x32xf32>
    %c8_48 = arith.constant 8 : index
    %c0_49 = arith.constant 0 : index
    %71 = vector.load %arg19[%c8_48, %c0_49] : memref<32x32xf32, #tpu.memory_space<vmem>>, vector<16x32xf32>
    tpu.vector_store %arg19[%c8_48, %c0_49], %70 {strides = array<i32>} : memref<32x32xf32, #tpu.memory_space<vmem>>, vector<16x32xf32>,
    %c4 = arith.constant 4 : index
    %c0_50 = arith.constant 0 : index
    %72 = vector.load %arg19[%c4, %c0_50] : memref<32x32xf32, #tpu.memory_space<vmem>>, vector<16x32xf32>
    %c6_51 = arith.constant 6 : index
    %c0_52 = arith.constant 0 : index
    %73 = vector.load %arg19[%c6_51, %c0_52] : memref<32x32xf32, #tpu.memory_space<vmem>>, vector<16x32xf32>
    %c8_53 = arith.constant 8 : index
    %c0_54 = arith.constant 0 : index
    %74 = vector.load %arg19[%c8_53, %c0_54] : memref<32x32xf32, #tpu.memory_space<vmem>>, vector<16x32xf32>
    %c10_55 = arith.constant 10 : index
    %c0_56 = arith.constant 0 : index
    %75 = vector.load %arg19[%c10_55, %c0_56] : memref<32x32xf32, #tpu.memory_space<vmem>>, vector<16x32xf32>
    %c12 = arith.constant 12 : index
    %c0_57 = arith.constant 0 : index
    %76 = vector.load %arg19[%c12, %c0_57] : memref<32x32xf32, #tpu.memory_space<vmem>>, vector<16x32xf32>
    %77 = tpu.concatenate %72, %73, %74, %75, %76 in 1 : vector<16x32xf32>, vector<16x32xf32>, vector<16x32xf32>, vector<16x32xf32>, vector<16x32xf32> -> vector<16x160xf32>
    %78 = arith.truncf %77 : vector<16x160xf32> to vector<16x160xbf16>
    %c1 = arith.constant 1 : index
    %c0_58 = arith.constant 0 : index
    %c0_59 = arith.constant 0 : index
    %79 = vector.load %arg8[%c1, %c0_58, %c0_59] : memref<3x160x32xbf16, #tpu.memory_space<vmem>>, vector<1x160x32xbf16>
    %80 = vector.shape_cast %79 : vector<1x160x32xbf16> to vector<160x32xbf16>
    %cst_60 = arith.constant dense<0.000000e+00> : vector<16x32xf32>
    %81 = tpu.matmul %78, %80, %cst_60 {dimension_numbers = #tpu.dot_dimension_numbers<[1], [0], [0], [1], [0, 0, 1, 1], [], []>} : vector<16x160xbf16>, vector<160x32xbf16>, vector<16x32xf32> -> vector<16x32xf32>
    %c1_61 = arith.constant 1 : index
    %c0_62 = arith.constant 0 : index
    %82 = vector.load %arg10[%c1_61, %c0_62] : memref<3x32xf32, #tpu.memory_space<vmem>>, vector<1x32xf32>
    %83 = vector.broadcast %82 : vector<1x32xf32> to vector<16x32xf32>
    %84 = arith.addf %81, %83 : vector<16x32xf32>
    %c0_63 = arith.constant 0 : index
    %c1_64 = arith.constant 1 : index
    %c0_65 = arith.constant 0 : index
    %85 = vector.load %arg3[%c0_63, %c1_64, %c0_65] : memref<1x3x32xf32, #tpu.memory_space<vmem>>, vector<1x1x32xf32>
    %86 = vector.shape_cast %85 : vector<1x1x32xf32> to vector<1x32xf32>
    %87 = vector.broadcast %86 : vector<1x32xf32> to vector<16x32xf32>
    %88 = arith.addf %84, %87 : vector<16x32xf32>
    %c1_66 = arith.constant 1 : index
    %c0_67 = arith.constant 0 : index
    %c0_68 = arith.constant 0 : index
    %89 = vector.load %arg9[%c1_66, %c0_67, %c0_68] : memref<3x160x32xbf16, #tpu.memory_space<vmem>>, vector<1x160x32xbf16>
    %90 = vector.shape_cast %89 : vector<1x160x32xbf16> to vector<160x32xbf16>
    %cst_69 = arith.constant dense<0.000000e+00> : vector<16x32xf32>
    %91 = tpu.matmul %78, %90, %cst_69 {dimension_numbers = #tpu.dot_dimension_numbers<[1], [0], [0], [1], [0, 0, 1, 1], [], []>} : vector<16x160xbf16>, vector<160x32xbf16>, vector<16x32xf32> -> vector<16x32xf32>
    %c1_70 = arith.constant 1 : index
    %c0_71 = arith.constant 0 : index
    %92 = vector.load %arg11[%c1_70, %c0_71] : memref<3x32xf32, #tpu.memory_space<vmem>>, vector<1x32xf32>
    %93 = vector.broadcast %92 : vector<1x32xf32> to vector<16x32xf32>
    %94 = arith.addf %91, %93 : vector<16x32xf32>
    %c0_72 = arith.constant 0 : index
    %c1_73 = arith.constant 1 : index
    %c0_74 = arith.constant 0 : index
    %95 = vector.load %arg4[%c0_72, %c1_73, %c0_74] : memref<1x3x32xf32, #tpu.memory_space<vmem>>, vector<1x1x32xf32>
    %96 = vector.shape_cast %95 : vector<1x1x32xf32> to vector<1x32xf32>
    %97 = vector.broadcast %96 : vector<1x32xf32> to vector<16x32xf32>
    %98 = arith.addf %94, %97 : vector<16x32xf32>
    %99 = math.tanh %88 : vector<16x32xf32>
    %100 = arith.negf %98 : vector<16x32xf32>
    %101 = math.exp %100 : vector<16x32xf32>
    %cst_75 = arith.constant 1.000000e+00 : f32
    %102 = vector.broadcast %cst_75 : f32 to vector<16x32xf32>
    %103 = arith.addf %102, %101 : vector<16x32xf32>
    %104 = arith.divf %102, %103 : vector<16x32xf32>
    %105 = arith.mulf %99, %104 : vector<16x32xf32>
    %106 = arith.truncf %105 : vector<16x32xf32> to vector<16x32xbf16>
    %c1_76 = arith.constant 1 : index
    %c0_77 = arith.constant 0 : index
    %c0_78 = arith.constant 0 : index
    %107 = vector.load %arg14[%c1_76, %c0_77, %c0_78] : memref<3x32x32xbf16, #tpu.memory_space<vmem>>, vector<1x32x32xbf16>
    %108 = vector.shape_cast %107 : vector<1x32x32xbf16> to vector<32x32xbf16>
    %cst_79 = arith.constant dense<0.000000e+00> : vector<16x32xf32>
    %109 = tpu.matmul %106, %108, %cst_79 {dimension_numbers = #tpu.dot_dimension_numbers<[1], [0], [0], [1], [0, 0, 1, 1], [], []>} : vector<16x32xbf16>, vector<32x32xbf16>, vector<16x32xf32> -> vector<16x32xf32>
    %c1_80 = arith.constant 1 : index
    %c0_81 = arith.constant 0 : index
    %110 = vector.load %arg15[%c1_80, %c0_81] : memref<3x32xf32, #tpu.memory_space<vmem>>, vector<1x32xf32>
    %111 = vector.broadcast %110 : vector<1x32xf32> to vector<16x32xf32>
    %112 = arith.addf %109, %111 : vector<16x32xf32>
    %113 = arith.addf %61, %112 : vector<16x32xf32>
    %c1_82 = arith.constant 1 : index
    %c0_83 = arith.constant 0 : index
    %c0_84 = arith.constant 0 : index
    %114 = vector.load %arg12[%c1_82, %c0_83, %c0_84] : memref<3x32x32xbf16, #tpu.memory_space<vmem>>, vector<1x32x32xbf16>
    %115 = vector.shape_cast %114 : vector<1x32x32xbf16> to vector<32x32xbf16>
    %cst_85 = arith.constant dense<0.000000e+00> : vector<16x32xf32>
    %116 = tpu.matmul %106, %115, %cst_85 {dimension_numbers = #tpu.dot_dimension_numbers<[1], [0], [0], [1], [0, 0, 1, 1], [], []>} : vector<16x32xbf16>, vector<32x32xbf16>, vector<16x32xf32> -> vector<16x32xf32>
    %c1_86 = arith.constant 1 : index
    %c0_87 = arith.constant 0 : index
    %117 = vector.load %arg13[%c1_86, %c0_87] : memref<3x32xf32, #tpu.memory_space<vmem>>, vector<1x32xf32>
    %118 = vector.broadcast %117 : vector<1x32xf32> to vector<16x32xf32>
    %119 = arith.addf %116, %118 : vector<16x32xf32>
    %120 = arith.addf %70, %119 : vector<16x32xf32>
    %121 = vector.broadcast %6 : vector<16x1xf32> to vector<16x32xf32>
    %122 = arith.mulf %120, %121 : vector<16x32xf32>
    %c8_88 = arith.constant 8 : index
    %c0_89 = arith.constant 0 : index
    %123 = vector.load %arg19[%c8_88, %c0_89] : memref<32x32xf32, #tpu.memory_space<vmem>>, vector<16x32xf32>
    tpu.vector_store %arg19[%c8_88, %c0_89], %122 {strides = array<i32>} : memref<32x32xf32, #tpu.memory_space<vmem>>, vector<16x32xf32>,
    %c0_90 = arith.constant 0 : index
    %c0_91 = arith.constant 0 : index
    %124 = vector.load %arg19[%c0_90, %c0_91] : memref<32x32xf32, #tpu.memory_space<vmem>>, vector<16x32xf32>
    %c4_92 = arith.constant 4 : index
    %c0_93 = arith.constant 0 : index
    %125 = vector.load %arg19[%c4_92, %c0_93] : memref<32x32xf32, #tpu.memory_space<vmem>>, vector<16x32xf32>
    %c8_94 = arith.constant 8 : index
    %c0_95 = arith.constant 0 : index
    %126 = vector.load %arg19[%c8_94, %c0_95] : memref<32x32xf32, #tpu.memory_space<vmem>>, vector<16x32xf32>
    %c12_96 = arith.constant 12 : index
    %c0_97 = arith.constant 0 : index
    %127 = vector.load %arg19[%c12_96, %c0_97] : memref<32x32xf32, #tpu.memory_space<vmem>>, vector<16x32xf32>
    %c16 = arith.constant 16 : index
    %c0_98 = arith.constant 0 : index
    %128 = vector.load %arg19[%c16, %c0_98] : memref<32x32xf32, #tpu.memory_space<vmem>>, vector<16x32xf32>
    %129 = tpu.concatenate %124, %125, %126, %127, %128 in 1 : vector<16x32xf32>, vector<16x32xf32>, vector<16x32xf32>, vector<16x32xf32>, vector<16x32xf32> -> vector<16x160xf32>
    %130 = arith.truncf %129 : vector<16x160xf32> to vector<16x160xbf16>
    %c2 = arith.constant 2 : index
    %c0_99 = arith.constant 0 : index
    %c0_100 = arith.constant 0 : index
    %131 = vector.load %arg8[%c2, %c0_99, %c0_100] : memref<3x160x32xbf16, #tpu.memory_space<vmem>>, vector<1x160x32xbf16>
    %132 = vector.shape_cast %131 : vector<1x160x32xbf16> to vector<160x32xbf16>
    %cst_101 = arith.constant dense<0.000000e+00> : vector<16x32xf32>
    %133 = tpu.matmul %130, %132, %cst_101 {dimension_numbers = #tpu.dot_dimension_numbers<[1], [0], [0], [1], [0, 0, 1, 1], [], []>} : vector<16x160xbf16>, vector<160x32xbf16>, vector<16x32xf32> -> vector<16x32xf32>
    %c2_102 = arith.constant 2 : index
    %c0_103 = arith.constant 0 : index
    %134 = vector.load %arg10[%c2_102, %c0_103] : memref<3x32xf32, #tpu.memory_space<vmem>>, vector<1x32xf32>
    %135 = vector.broadcast %134 : vector<1x32xf32> to vector<16x32xf32>
    %136 = arith.addf %133, %135 : vector<16x32xf32>
    %c0_104 = arith.constant 0 : index
    %c2_105 = arith.constant 2 : index
    %c0_106 = arith.constant 0 : index
    %137 = vector.load %arg3[%c0_104, %c2_105, %c0_106] : memref<1x3x32xf32, #tpu.memory_space<vmem>>, vector<1x1x32xf32>
    %138 = vector.shape_cast %137 : vector<1x1x32xf32> to vector<1x32xf32>
    %139 = vector.broadcast %138 : vector<1x32xf32> to vector<16x32xf32>
    %140 = arith.addf %136, %139 : vector<16x32xf32>
    %c2_107 = arith.constant 2 : index
    %c0_108 = arith.constant 0 : index
    %c0_109 = arith.constant 0 : index
    %141 = vector.load %arg9[%c2_107, %c0_108, %c0_109] : memref<3x160x32xbf16, #tpu.memory_space<vmem>>, vector<1x160x32xbf16>
    %142 = vector.shape_cast %141 : vector<1x160x32xbf16> to vector<160x32xbf16>
    %cst_110 = arith.constant dense<0.000000e+00> : vector<16x32xf32>
    %143 = tpu.matmul %130, %142, %cst_110 {dimension_numbers = #tpu.dot_dimension_numbers<[1], [0], [0], [1], [0, 0, 1, 1], [], []>} : vector<16x160xbf16>, vector<160x32xbf16>, vector<16x32xf32> -> vector<16x32xf32>
    %c2_111 = arith.constant 2 : index
    %c0_112 = arith.constant 0 : index
    %144 = vector.load %arg11[%c2_111, %c0_112] : memref<3x32xf32, #tpu.memory_space<vmem>>, vector<1x32xf32>
    %145 = vector.broadcast %144 : vector<1x32xf32> to vector<16x32xf32>
    %146 = arith.addf %143, %145 : vector<16x32xf32>
    %c0_113 = arith.constant 0 : index
    %c2_114 = arith.constant 2 : index
    %c0_115 = arith.constant 0 : index
    %147 = vector.load %arg4[%c0_113, %c2_114, %c0_115] : memref<1x3x32xf32, #tpu.memory_space<vmem>>, vector<1x1x32xf32>
    %148 = vector.shape_cast %147 : vector<1x1x32xf32> to vector<1x32xf32>
    %149 = vector.broadcast %148 : vector<1x32xf32> to vector<16x32xf32>
    %150 = arith.addf %146, %149 : vector<16x32xf32>
    %151 = math.tanh %140 : vector<16x32xf32>
    %152 = arith.negf %150 : vector<16x32xf32>
    %153 = math.exp %152 : vector<16x32xf32>
    %cst_116 = arith.constant 1.000000e+00 : f32
    %154 = vector.broadcast %cst_116 : f32 to vector<16x32xf32>
    %155 = arith.addf %154, %153 : vector<16x32xf32>
    %156 = arith.divf %154, %155 : vector<16x32xf32>
    %157 = arith.mulf %151, %156 : vector<16x32xf32>
    %158 = arith.truncf %157 : vector<16x32xf32> to vector<16x32xbf16>
    %c2_117 = arith.constant 2 : index
    %c0_118 = arith.constant 0 : index
    %c0_119 = arith.constant 0 : index
    %159 = vector.load %arg14[%c2_117, %c0_118, %c0_119] : memref<3x32x32xbf16, #tpu.memory_space<vmem>>, vector<1x32x32xbf16>
    %160 = vector.shape_cast %159 : vector<1x32x32xbf16> to vector<32x32xbf16>
    %cst_120 = arith.constant dense<0.000000e+00> : vector<16x32xf32>
    %161 = tpu.matmul %158, %160, %cst_120 {dimension_numbers = #tpu.dot_dimension_numbers<[1], [0], [0], [1], [0, 0, 1, 1], [], []>} : vector<16x32xbf16>, vector<32x32xbf16>, vector<16x32xf32> -> vector<16x32xf32>
    %c2_121 = arith.constant 2 : index
    %c0_122 = arith.constant 0 : index
    %162 = vector.load %arg15[%c2_121, %c0_122] : memref<3x32xf32, #tpu.memory_space<vmem>>, vector<1x32xf32>
    %163 = vector.broadcast %162 : vector<1x32xf32> to vector<16x32xf32>
    %164 = arith.addf %161, %163 : vector<16x32xf32>
    %165 = arith.addf %113, %164 : vector<16x32xf32>
    %166 = vector.broadcast %6 : vector<16x1xf32> to vector<16x32xf32>
    %167 = arith.mulf %165, %166 : vector<16x32xf32>
    %168 = arith.truncf %167 : vector<16x32xf32> to vector<16x32xbf16>
    %c0_123 = arith.constant 0 : index
    %c0_124 = arith.constant 0 : index
    %169 = vector.load %arg16[%c0_123, %c0_124] : memref<32x8xbf16, #tpu.memory_space<vmem>>, vector<32x8xbf16>
    %cst_125 = arith.constant dense<0.000000e+00> : vector<16x8xf32>
    %170 = tpu.matmul %168, %169, %cst_125 {dimension_numbers = #tpu.dot_dimension_numbers<[1], [0], [0], [1], [0, 0, 1, 1], [], []>} : vector<16x32xbf16>, vector<32x8xbf16>, vector<16x8xf32> -> vector<16x8xf32>
    %c0_126 = arith.constant 0 : index
    %c0_127 = arith.constant 0 : index
    %171 = vector.load %arg17[%c0_126, %c0_127] : memref<1x8xf32, #tpu.memory_space<vmem>>, vector<1x8xf32>
    %172 = vector.broadcast %171 : vector<1x8xf32> to vector<16x8xf32>
    %173 = arith.addf %170, %172 : vector<16x8xf32>
    %174 = vector.broadcast %6 : vector<16x1xf32> to vector<16x8xf32>
    %175 = arith.mulf %173, %174 : vector<16x8xf32>
    %176 = vector.extract_strided_slice %175 {offsets = [0, 0], sizes = [16, 4], strides = [1, 1]} : vector<16x8xf32> to vector<16x4xf32>
    %177 = vector.extract_strided_slice %175 {offsets = [0, 4], sizes = [16, 4], strides = [1, 1]} : vector<16x8xf32> to vector<16x4xf32>
    %c0_128 = arith.constant 0 : index
    %c0_129 = arith.constant 0 : index
    %c0_130 = arith.constant 0 : index
    %178 = vector.load %arg5[%c0_128, %c0_129, %c0_130] : memref<1x16x4xf32, #tpu.memory_space<vmem>>, vector<1x16x4xf32>
    %179 = vector.shape_cast %178 : vector<1x16x4xf32> to vector<16x4xf32>
    %180 = math.exp %177 : vector<16x4xf32>
    %181 = arith.mulf %179, %180 : vector<16x4xf32>
    %182 = arith.addf %176, %181 : vector<16x4xf32>
    %183 = vector.broadcast %6 : vector<16x1xf32> to vector<16x4xf32>
    %184 = arith.mulf %182, %183 : vector<16x4xf32>
    %185 = tpu.concatenate %184, %176, %177 in 1 : vector<16x4xf32>, vector<16x4xf32>, vector<16x4xf32> -> vector<16x12xf32>
    %c0_131 = arith.constant 0 : index
    %c0_132 = arith.constant 0 : index
    %c0_133 = arith.constant 0 : index
    %186 = vector.load %arg18[%c0_131, %c0_132, %c0_133] : memref<1x16x12xf32, #tpu.memory_space<vmem>>, vector<1x16x12xf32>
    %187 = vector.shape_cast %186 : vector<1x16x12xf32> to vector<16x12xf32>
    %188 = vector.shape_cast %185 : vector<16x12xf32> to vector<1x16x12xf32>
    tpu.vector_store %arg18[%c0_131, %c0_132, %c0_133], %188 {strides = array<i32>} : memref<1x16x12xf32, #tpu.memory_space<vmem>>, vector<1x16x12xf32>,
    return
  }
  func.func @transform_0(%arg0: i32, %arg1: memref<2xi32, #tpu.memory_space<smem>>) -> (i32, i32, i32) {
    %c0_i32 = arith.constant 0 : i32
    %c0_i32_0 = arith.constant 0 : i32
    %c0_i32_1 = arith.constant 0 : i32
    return %arg0, %c0_i32, %c0_i32_0 : i32, i32, i32
  }
  func.func @transform_1(%arg0: i32, %arg1: memref<2xi32, #tpu.memory_space<smem>>) -> (i32, i32, i32) {
    %c0_i32 = arith.constant 0 : i32
    %c0_i32_0 = arith.constant 0 : i32
    %c0_i32_1 = arith.constant 0 : i32
    return %arg0, %c0_i32, %c0_i32_0 : i32, i32, i32
  }
  func.func @transform_2(%arg0: i32, %arg1: memref<2xi32, #tpu.memory_space<smem>>) -> (i32, i32, i32) {
    %c0_i32 = arith.constant 0 : i32
    %c0_i32_0 = arith.constant 0 : i32
    %c0_i32_1 = arith.constant 0 : i32
    return %arg0, %c0_i32, %c0_i32_0 : i32, i32, i32
  }
  func.func @transform_3(%arg0: i32, %arg1: memref<2xi32, #tpu.memory_space<smem>>) -> (i32, i32, i32) {
    %c0_i32 = arith.constant 0 : i32
    %c0_i32_0 = arith.constant 0 : i32
    %c0_i32_1 = arith.constant 0 : i32
    return %arg0, %c0_i32, %c0_i32_0 : i32, i32, i32
  }
  func.func @transform_4(%arg0: i32, %arg1: memref<2xi32, #tpu.memory_space<smem>>) -> (i32, i32) {
    %c0_i32 = arith.constant 0 : i32
    %c0_i32_0 = arith.constant 0 : i32
    %c0_i32_1 = arith.constant 0 : i32
    return %c0_i32, %c0_i32_0 : i32, i32
  }
  func.func @transform_5(%arg0: i32, %arg1: memref<2xi32, #tpu.memory_space<smem>>) -> (i32, i32) {
    %c0_i32 = arith.constant 0 : i32
    %c0_i32_0 = arith.constant 0 : i32
    %c0_i32_1 = arith.constant 0 : i32
    return %c0_i32, %c0_i32_0 : i32, i32
  }
  func.func @transform_6(%arg0: i32, %arg1: memref<2xi32, #tpu.memory_space<smem>>) -> (i32, i32, i32) {
    %c0_i32 = arith.constant 0 : i32
    %c0_i32_0 = arith.constant 0 : i32
    %c0_i32_1 = arith.constant 0 : i32
    %c0_i32_2 = arith.constant 0 : i32
    return %c0_i32, %c0_i32_0, %c0_i32_1 : i32, i32, i32
  }
  func.func @transform_7(%arg0: i32, %arg1: memref<2xi32, #tpu.memory_space<smem>>) -> (i32, i32, i32) {
    %c0_i32 = arith.constant 0 : i32
    %c0_i32_0 = arith.constant 0 : i32
    %c0_i32_1 = arith.constant 0 : i32
    %c0_i32_2 = arith.constant 0 : i32
    return %c0_i32, %c0_i32_0, %c0_i32_1 : i32, i32, i32
  }
  func.func @transform_8(%arg0: i32, %arg1: memref<2xi32, #tpu.memory_space<smem>>) -> (i32, i32) {
    %c0_i32 = arith.constant 0 : i32
    %c0_i32_0 = arith.constant 0 : i32
    %c0_i32_1 = arith.constant 0 : i32
    return %c0_i32, %c0_i32_0 : i32, i32
  }
  func.func @transform_9(%arg0: i32, %arg1: memref<2xi32, #tpu.memory_space<smem>>) -> (i32, i32) {
    %c0_i32 = arith.constant 0 : i32
    %c0_i32_0 = arith.constant 0 : i32
    %c0_i32_1 = arith.constant 0 : i32
    return %c0_i32, %c0_i32_0 : i32, i32
  }
  func.func @transform_10(%arg0: i32, %arg1: memref<2xi32, #tpu.memory_space<smem>>) -> (i32, i32, i32) {
    %c0_i32 = arith.constant 0 : i32
    %c0_i32_0 = arith.constant 0 : i32
    %c0_i32_1 = arith.constant 0 : i32
    %c0_i32_2 = arith.constant 0 : i32
    return %c0_i32, %c0_i32_0, %c0_i32_1 : i32, i32, i32
  }
  func.func @transform_11(%arg0: i32, %arg1: memref<2xi32, #tpu.memory_space<smem>>) -> (i32, i32) {
    %c0_i32 = arith.constant 0 : i32
    %c0_i32_0 = arith.constant 0 : i32
    %c0_i32_1 = arith.constant 0 : i32
    return %c0_i32, %c0_i32_0 : i32, i32
  }
  func.func @transform_12(%arg0: i32, %arg1: memref<2xi32, #tpu.memory_space<smem>>) -> (i32, i32, i32) {
    %c0_i32 = arith.constant 0 : i32
    %c0_i32_0 = arith.constant 0 : i32
    %c0_i32_1 = arith.constant 0 : i32
    %c0_i32_2 = arith.constant 0 : i32
    return %c0_i32, %c0_i32_0, %c0_i32_1 : i32, i32, i32
  }
  func.func @transform_13(%arg0: i32, %arg1: memref<2xi32, #tpu.memory_space<smem>>) -> (i32, i32) {
    %c0_i32 = arith.constant 0 : i32
    %c0_i32_0 = arith.constant 0 : i32
    %c0_i32_1 = arith.constant 0 : i32
    return %c0_i32, %c0_i32_0 : i32, i32
  }
  func.func @transform_14(%arg0: i32, %arg1: memref<2xi32, #tpu.memory_space<smem>>) -> (i32, i32) {
    %c0_i32 = arith.constant 0 : i32
    %c0_i32_0 = arith.constant 0 : i32
    %c0_i32_1 = arith.constant 0 : i32
    return %c0_i32, %c0_i32_0 : i32, i32
  }
  func.func @transform_15(%arg0: i32, %arg1: memref<2xi32, #tpu.memory_space<smem>>) -> (i32, i32) {
    %c0_i32 = arith.constant 0 : i32
    %c0_i32_0 = arith.constant 0 : i32
    %c0_i32_1 = arith.constant 0 : i32
    return %c0_i32, %c0_i32_0 : i32, i32
  }
  func.func @transform_16(%arg0: i32, %arg1: memref<2xi32, #tpu.memory_space<smem>>) -> (i32, i32, i32) {
    %c0_i32 = arith.constant 0 : i32
    %c0_i32_0 = arith.constant 0 : i32
    %c0_i32_1 = arith.constant 0 : i32
    return %arg0, %c0_i32, %c0_i32_0 : i32, i32, i32
  }
}

</mosaic_0001>

<bundles_post_ra>
// kernel: tpu_custom_call.1
= control target key start
LH: loop header
LB: loop body
LE: loop exit
PB: predicated region body
PF: predicated region fallthrough
CT: control target
= control target key end

     0   :  { %s3281_s0 = inlined_call_operand.vmem [shape: s32[2], index: 0, kind: input, shape index: {}]   ;;  %s3282_s1 = inlined_call_operand.vmem [shape: bf16[2,16,8], index: 1, kind: input, shape index: {}]   ;;  %s3283_s2 = inlined_call_operand.vmem [shape: f32[2,3,32], index: 2, kind: input, shape index: {}]   ;;  %s3284_s3 = inlined_call_operand.vmem [shape: f32[2,3,32], index: 3, kind: input, shape index: {}]   ;;  %s3285_s4 = inlined_call_operand.vmem [shape: f32[2,16,4], index: 4, kind: input, shape index: {}]   ;;  %s3286_s5 = inlined_call_operand.vmem [shape: bf16[8,32], index: 5, kind: input, shape index: {}]   ;;  %s3287_s6 = inlined_call_operand.vmem [shape: f32[1,32], index: 6, kind: input, shape index: {}]   ;;  %s3288_s7 = inlined_call_operand.vmem [shape: bf16[3,160,32], index: 7, kind: input, shape index: {}]   ;;  %s3289_s8 = inlined_call_operand.vmem [shape: bf16[3,160,32], index: 8, kind: input, shape index: {}]   ;;  %s3290_s9 = inlined_call_operand.vmem [shape: f32[3,32], index: 9, kind: input, shape index: {}]   ;;  %s3291_s10 = inlined_call_operand.vmem [shape: f32[3,32], index: 10, kind: input, shape index: {}]   ;;  %s3292_s11 = inlined_call_operand.vmem [shape: bf16[3,32,32], index: 11, kind: input, shape index: {}]   ;;  %s3293_s12 = inlined_call_operand.vmem [shape: f32[3,32], index: 12, kind: input, shape index: {}]   ;;  %s3294_s13 = inlined_call_operand.vmem [shape: bf16[3,32,32], index: 13, kind: input, shape index: {}]   ;;  %s3295_s14 = inlined_call_operand.vmem [shape: f32[3,32], index: 14, kind: input, shape index: {}]   ;;  %s3296_s15 = inlined_call_operand.vmem [shape: bf16[32,8], index: 15, kind: input, shape index: {}]   ;;  %s3297_s16 = inlined_call_operand.vmem [shape: f32[1,8], index: 16, kind: input, shape index: {}]   ;;  %s3298_s17 = inlined_call_operand.vmem [shape: f32[2,16,12], index: 17, kind: output, shape index: {}]  }
   0x1   :  { %3299 = sst [smem:[#allocation6_spill]] %s3281_s0 }
   0x2   :  { %3300 = sst [smem:[#allocation7_spill]] %s3282_s1 }
   0x3   :  { %3301 = sst [smem:[#allocation8_spill]] %s3285_s4 }
   0x4   :  { %s3302_s26 = sld [smem:[#allocation6_spill]] }
   0xa   :  { %s22_s4 = sshll.u32 %s3302_s26, 4  ;;  %s23_s4 = int_to_ptr.vmem [resolvable:$true] %s22_s4 }
   0xb   :  { %s2664_s27 = scalar_lea.vmem %s23_s4, 16  ;;  %p2669_p1 = scmp.lt.s32.totalorder %s23_s4, %s23_s4 }
   0xc   :  { %p2665_p0 = scmp.ne.s32.totalorder %s23_s4, %s2664_s27  ;;  %p2670_p2 = scmp.lt.s32.totalorder %s2664_s27, %s2664_s27 }
   0xe   :  { %p2671_p3 = por %p2670_p2, %p2669_p1 }
  0x10   :  { %p2672_p4 = pnand %p2671_p3, %p2665_p0 }
  0x12   :  { %2675 = shalt.err (!%p2672_p4)  }
  0x13   :  { %s2686_s28 = smov [#allocation4]  }
  0x14   :  { %25 = dma.vmem_to_smem %s23_s4, 16, %s2686_s28, [#allocation3] }
  0x15   :  { %2680 = dma.done.wait [#allocation3], 16 }
  0x16   :  { %2681 = vsyncadd [#allocation3], 4294967280 }
  0x17   :  { %27 = sfence }
  0x18   :  { %s2788_s29 = smov 0  }
  0x19 LB: > { %s2794_s0 = sadd.s32 4294967295, %s2684_s29   ;;  %p2196_p5 = scmp.ge.s32.totalorder %s2684_s29, 1  ;;  %s2684_s29 = sphi %s2788_s29, %s33_s29  }
  0x1a   : > { %p497_p6 = scmp.lt.s32.totalorder %s2684_s29, 3 }
  0x1c   : > { %p498_p7 = pnand %p2196_p5, %p497_p6 }
  0x1d   : > { %p560_p8 = scmp.lt.s32.totalorder (!%p498_p7), %s2794_s0, 1  ;;  %s3303_s21 = sld [smem:[#allocation7_spill]] (!%p498_p7) }
  0x1e   : > { %501 = sbr.rel (%p498_p7) target bundleno = 2311 (0x907), region = 84  ;;  %s584_s4 = sld [smem:[#allocation4 + %s2794_s0]] (!%p498_p7) }
  0x1f   : > { %s2690_s26 = smov (!%p498_p7), 96   ;;  %s2691_s27 = smov (!%p498_p7), 32  }
  0x20   : > { %s2692_s28 = smov (!%p498_p7), 64   ;;  %s2694_s24 = smov (!%p498_p7), 4  }
  0x23   : > { %v597_v0 = vld [vmem:[%s3286_s5] sm:$0xf]  ;;  %vm614_vm0 = vcmask 1043456   ;;  %v2687_v1 = vmov 0.0   ;;  %vm2688_vm1 = vmmov 0   ;;  %s2806_s18 = scalar_select %p560_p8, %s2794_s0, 1  ;;  %v585_v21 = vlaneseq }
  0x24   : > { %2435 = vmatprep.subr.bf16.mxu0 %v2687_v1  ;;  %v616_v2 = vsel %vm614_vm0, %v597_v0, 0  ;;  %2437 = vmatprep.mubr.msk.bf16.mxu0 %vm2688_vm1, %v2687_v1  ;;  %vm610_vm2 = vcmask 64512   ;;  %vm661_vm3 = vcmask 261120   ;;  %v2552_v4 = vld [vmem:[%s3288_s7 + $0x38] sm:$0xff]   ;;  %v2689_v6 = vmov 0   ;;  %v2554_v7 = vld [vmem:[%s3288_s7 + $0x30] sm:$0xff]  }
  0x25   : > { %2436 = vmatpush3.bf16.msra.mxu0 %v616_v2  ;;  %s2412_s19 = sshll.u32 %s2806_s18, 3  ;;  %663 = vst.msk [vmem:[#allocation2 + $0x8] sm:$0xff] %vm661_vm3, %v2687_v1  ;;  %662 = vst.msk [vmem:[#allocation2] sm:$0xff] %vm661_vm3, %v2687_v1  ;;  %v2553_v5 = vld [vmem:[%s3289_s8 + $0x38] sm:$0xff]   ;;  %800 = vmatprep.subr.bf16.mxu1 %v2689_v6  ;;  %v2555_v8 = vld [vmem:[%s3289_s8 + $0x30] sm:$0xff]   ;;  %v586_v22 = vshrl.u32 %v585_v21, 7  ;;  %v588_v23 = vstv %s584_s4 }
  0x26   : > { %s564_s22 = scalar_lea.vmem %s3303_s21, %s2412_s19  ;;  %664 = vst.msk [vmem:[#allocation2 + $0x10] sm:$0xff] %vm661_vm3, %v2687_v1  ;;  %665 = vst.msk [vmem:[#allocation2 + $0x18] sm:$0xff] %vm661_vm3, %v2687_v1  ;;  %933 = vmatprep.subr.bf16.mxu0 %v2689_v6  ;;  %801 = vmatpush1.bf16.msra.mxu1 %v2552_v4  ;;  %v2556_v9 = vld [vmem:[%s3288_s7 + $0x28] sm:$0xff]   ;;  %v2558_v11 = vld [vmem:[%s3288_s7 + $0x20] sm:$0xff]   ;;  %vm704_vm6 = vcmask 523264   ;;  %vm707_vm7 = vcmask 785408  }
  0x27   : > { %v2551_v3 = vld [vmem:[%s564_s22] sm:$0xff]   ;;  %802 = vmatprep.subr.bf16.mxu1 %v2689_v6  ;;  %v2557_v10 = vld [vmem:[%s3289_s8 + $0x28] sm:$0xff]   ;;  %v2560_v13 = vld [vmem:[%s3288_s7 + $0x18] sm:$0xff]   ;;  %vm589_vm4 = vcmp.lt.s32.totalorder %v586_v22, %v588_v23  ;;  %v587_v24 = vadd.s32 8, %v586_v22  ;;  %s2199_s23 = sshll.u32 %s2806_s18, 2  ;;  %s2413_s25 = sshll.u32 %s2806_s18, 4 }
  0x28   : > { %2438 = vmatmul.mubr.msk.bf16.vlgmr.msra.gmra.mxu0 %vm610_vm2, %v2551_v3  ;;  %v2559_v12 = vld [vmem:[%s3289_s8 + $0x20] sm:$0xff]   ;;  %v2561_v14 = vld [vmem:[%s3289_s8 + $0x18] sm:$0xff]   ;;  %v2562_v15 = vld [vmem:[%s3288_s7 + $0x10] sm:$0xff]   ;;  %v2892_v26 = vsel %vm589_vm4, 1.0, %v2687_v1  ;;  %s2958_s4 = scalar_lea.vmem %s3284_s3, %s2199_s23  ;;  %s2970_s22 = scalar_lea.vmem %s3283_s2, %s2199_s23  ;;  %vm2093_vm8 = vcmask 31744   ;;  %vm2098_vm9 = vcmask 97280  }
  0x29   : > { %934 = vmatpush1.bf16.msra.mxu0 %v2553_v5  ;;  %v2563_v16 = vld [vmem:[%s3289_s8 + $0x10] sm:$0xff]   ;;  %v2564_v17 = vld [vmem:[%s3288_s7 + $0x8] sm:$0xff]   ;;  %v2566_v19 = vld [vmem:[%s3288_s7] sm:$0xff]   ;;  %vm590_vm5 = vcmp.lt.s32.totalorder %v587_v24, %v588_v23  ;;  %s3304_s0 = sld [smem:[#allocation8_spill]]  ;;  %s582_s20 = scalar_lea.vmem %s3298_s17, %s2413_s25 }
  0x2a   : > { %935 = vmatprep.subr.bf16.mxu0 %v2689_v6  ;;  %803 = vmatpush1.bf16.msra.mxu1 %v2554_v7  ;;  %v2565_v18 = vld [vmem:[%s3289_s8 + $0x8] sm:$0xff]   ;;  %v2567_v20 = vld [vmem:[%s3289_s8] sm:$0xff]   ;;  %v2898_v31 = vsel %vm590_vm5, 1.0, %v2687_v1 }
  0x2b   : > { %804 = vmatprep.subr.bf16.mxu1 %v2689_v6  ;;  %v2207_v25 = vld [vmem:[%s3287_s6] ss:$0 sm:$0xff]  ;;  %v2568_v36 = vld [vmem:[%s3288_s7 + $0x48] sm:$0xff]  }
  0x2c   : > { %v2569_v37 = vld [vmem:[%s3289_s8 + $0x48] sm:$0xff]   ;;  %v2570_v38 = vld [vmem:[%s3288_s7 + $0x40] sm:$0xff]  }
  0x2d   : > { %936 = vmatpush1.bf16.msra.mxu0 %v2555_v8  ;;  %v2571_v39 = vld [vmem:[%s3289_s8 + $0x40] sm:$0xff]   ;;  %v2572_v8 = vld [vmem:[%s3292_s11 + $0x8] sm:$0xff]  }
  0x2e   : > { %937 = vmatprep.subr.bf16.mxu0 %v2689_v6  ;;  %805 = vmatpush1.bf16.msra.mxu1 %v2556_v9  ;;  %v2573_v9 = vld [vmem:[%s3294_s13 + $0x8] sm:$0xff]  }
  0x2f   : > { %806 = vmatprep.subr.bf16.mxu1 %v2689_v6 }
  0x31   : > { %938 = vmatpush1.bf16.msra.mxu0 %v2557_v10  ;;  %v2574_v10 = vld [vmem:[%s3292_s11] sm:$0xff]  }
  0x32   : > { %939 = vmatprep.subr.bf16.mxu0 %v2689_v6  ;;  %807 = vmatpush1.bf16.msra.mxu1 %v2558_v11  ;;  %v2575_v11 = vld [vmem:[%s3294_s13] sm:$0xff]  }
  0x33   : > { %808 = vmatprep.subr.bf16.mxu1 %v2689_v6 }
  0x35   : > { %940 = vmatpush1.bf16.msra.mxu0 %v2559_v12  ;;  %v2223_v12 = vld [vmem:[%s3291_s10] ss:$0 sm:$0xff] }
  0x36   : > { %941 = vmatprep.subr.bf16.mxu0 %v2689_v6  ;;  %809 = vmatpush1.bf16.msra.mxu1 %v2560_v13 }
  0x37   : > { %810 = vmatprep.subr.bf16.mxu1 %v2689_v6 }
  0x39   : > { %942 = vmatpush1.bf16.msra.mxu0 %v2561_v14 }
  0x3a   : > { %943 = vmatprep.subr.bf16.mxu0 %v2689_v6  ;;  %811 = vmatpush1.bf16.msra.mxu1 %v2562_v15  ;;  %v2235_v15 = vld [vmem:[%s2958_s4] ss:$0 sm:$0xff] }
  0x3b   : > { %812 = vmatprep.subr.bf16.mxu1 %v2689_v6 }
  0x3d   : > { %944 = vmatpush1.bf16.msra.mxu0 %v2563_v16 }
  0x3e   : > { %945 = vmatprep.subr.bf16.mxu0 %v2689_v6  ;;  %813 = vmatpush1.bf16.msra.mxu1 %v2564_v17 }
  0x3f   : > { %814 = vmatprep.subr.bf16.mxu1 %v2689_v6 }
  0x41   : > { %946 = vmatpush1.bf16.msra.mxu0 %v2565_v18 }
  0x42   : > { %947 = vmatprep.subr.bf16.mxu0 %v2689_v6  ;;  %815 = vmatpush1.bf16.msra.mxu1 %v2566_v19 }
  0x43   : > { %828 = vmatprep.subr.bf16.mxu1 %v2689_v6 }
  0x45   : > { %948 = vmatpush1.bf16.msra.mxu0 %v2567_v20 }
  0x46   : > { %961 = vmatprep.subr.bf16.mxu0 %v2689_v6  ;;  %829 = vmatpush2.bf16.msra.mxu1 %v2568_v36 }
  0x47   : > { %830 = vmatprep.subr.bf16.mxu1 %v2689_v6 }
  0x49   : > { %962 = vmatpush2.bf16.msra.mxu0 %v2569_v37 }
  0x4a   : > { %963 = vmatprep.subr.bf16.mxu0 %v2689_v6  ;;  %831 = vmatpush2.bf16.msra.mxu1 %v2570_v38 }
  0x4b   : > { %2441 = vmatprep.subr.bf16.mxu1 %v2687_v1 }
  0x4d   : > { %964 = vmatpush2.bf16.msra.mxu0 %v2571_v39 }
  0x4e   : > { %2449 = vmatprep.subr.bf16.mxu0 %v2687_v1 }
  0xe8   : > { %v652_v27 = vpop.f32.mrf.mxu0 }
  0xe9   : > { %v653_v28 = vadd.f32 %v2207_v25, %v652_v27 }
  0xea   : > { %v2439_v29 = vpop.f32.mrf.mxu0 }
  0xeb   : > { %v2895_v30 = vmul.f32 %v2892_v26, %v653_v28  ;;  %v2210_v29 = vld [vmem:[%s3290_s9] ss:$0 sm:$0xff] }
  0xec   : > { %v655_v32 = vpop.f32.mrf.mxu0 }
  0xed   : > { %666 = vst.msk [vmem:[#allocation2 + $0x8] sm:$0xff] %vm661_vm3, %v2895_v30  ;;  %v656_v33 = vadd.f32 %v2207_v25, %v655_v32 }
  0xee   : > { %v2440_v34 = vpop.f32.mrf.mxu0 }
  0xef   : > { %v2903_v35 = vmul.f32 %v2898_v31, %v656_v33  ;;  %v2222_v33 = vld [vmem:[%s2970_s22] ss:$0 sm:$0xff] }
  0xf1   : > { %667 = vst.msk [vmem:[#allocation2 + $0x10] sm:$0xff] %vm661_vm3, %v2903_v35 }
  0xf4   : > { %v670_v45 = vld [vmem:[#allocation2 + $0x7] sm:$0xff] }
  0xf5   : > { %v672_v50 = vld [vmem:[#allocation2 + $0x8] sm:$0xff] }
  0xf6   : > { %v668_v57 = vld [vmem:[#allocation2 + $0x6] sm:$0xff] }
  0xf8   : > { %v676_v40 = vld [vmem:[#allocation2 + $0xa] sm:$0xff]  ;;  %v677_v41 = vld [vmem:[#allocation2 + $0x12] sm:$0xff] }
  0xf9   : > { %v674_v42 = vld [vmem:[#allocation2 + $0x9] sm:$0xff]  ;;  %v711_v43 = vpack.c.bf16 %v677_v41, %v676_v40  ;;  %v675_v44 = vld [vmem:[#allocation2 + $0x11] sm:$0xff] }
  0xfa   : > { %v671_v46 = vld [vmem:[#allocation2 + $0xf] sm:$0xff]  ;;  %v2516_v47 = vpack.i.bf16 %v675_v44, %v674_v42 }
  0xfb   : > { %v2506_v48 = vpack.i.bf16 %v671_v46, %v670_v45  ;;  %2221 = vmatprep.mubr.msk.bf16.mxu1 %vm661_vm3, %v711_v43  ;;  %2234 = vmatprep.mubr.msk.bf16.mxu0 %vm661_vm3, %v711_v43  ;;  %v673_v49 = vld [vmem:[#allocation2 + $0x10] sm:$0xff] }
  0xfc   : > { %2517 = vrot.lane.b32.xlu1 %v2516_v47, %s2690_s26  ;;  %v2511_v51 = vpack.i.bf16 %v673_v49, %v672_v50  ;;  %v669_v58 = vld [vmem:[#allocation2 + $0xe] sm:$0xff] }
  0xfd   : > { %2507 = vrot.lane.b32.xlu0 %v2506_v48, %s2691_s27  ;;  %v2576_v49 = vld [vmem:[%s3288_s7 + $0x88] sm:$0xff]  }
  0xfe   : > { %v2577_v50 = vld [vmem:[%s3289_s8 + $0x88] sm:$0xff]  }
 0x101   : > { %2512 = vrot.lane.b32.xlu0 %v2511_v51, %s2692_s28  ;;  %v2578_v51 = vld [vmem:[%s3288_s7 + $0x80] sm:$0xff]  }
 0x16e   : > { %v2518_v55 = vpop.permute.xlu1 %2517 }
 0x16f   : > { %v2508_v52 = vpop.permute.xlu0 %2507  ;;  %v2520_v61 = vunpack.i.h.bf16 %v2518_v55  ;;  %v2519_v62 = vunpack.i.l.bf16 %v2518_v55  ;;  %v2582_v55 = vld [vmem:[%s3288_s7 + $0x70] sm:$0xff]  }
 0x170   : > { %v2510_v53 = vunpack.i.h.bf16 %v2508_v52  ;;  %v2509_v54 = vunpack.i.l.bf16 %v2508_v52  ;;  %v2579_v52 = vld [vmem:[%s3289_s8 + $0x80] sm:$0xff]  }
 0x172   : > { %v702_v63 = vsel %vm661_vm3, %v668_v57, %v2509_v54  ;;  %v703_v0 = vsel %vm661_vm3, %v669_v58, %v2510_v53  ;;  %v2580_v53 = vld [vmem:[%s3288_s7 + $0x78] sm:$0xff]   ;;  %v2584_v57 = vld [vmem:[%s3288_s7 + $0x68] sm:$0xff]  }
 0x173   : > { %v2513_v56 = vpop.permute.xlu0 %2512  ;;  %v2581_v54 = vld [vmem:[%s3289_s8 + $0x78] sm:$0xff]   ;;  %v2585_v58 = vld [vmem:[%s3289_s8 + $0x68] sm:$0xff]  }
 0x174   : > { %v2515_v59 = vunpack.i.h.bf16 %v2513_v56  ;;  %v2514_v60 = vunpack.i.l.bf16 %v2513_v56  ;;  %v2583_v56 = vld [vmem:[%s3289_s8 + $0x70] sm:$0xff]  }
 0x176   : > { %v705_v2 = vsel %vm704_vm6, %v702_v63, %v2514_v60  ;;  %v706_v3 = vsel %vm704_vm6, %v703_v0, %v2515_v59  ;;  %v2586_v59 = vld [vmem:[%s3288_s7 + $0x60] sm:$0xff]   ;;  %v2590_v63 = vld [vmem:[%s3288_s7 + $0x50] sm:$0xff]  }
 0x177   : > { %v708_v4 = vsel %vm707_vm7, %v705_v2, %v2519_v62  ;;  %v709_v5 = vsel %vm707_vm7, %v706_v3, %v2520_v61  ;;  %v2587_v60 = vld [vmem:[%s3289_s8 + $0x60] sm:$0xff]   ;;  %v2588_v61 = vld [vmem:[%s3288_s7 + $0x58] sm:$0xff]   ;;  %v2591_v0 = vld [vmem:[%s3289_s8 + $0x50] sm:$0xff]  }
 0x178   : > { %v710_v7 = vpack.c.bf16 %v709_v5, %v708_v4  ;;  %v2589_v62 = vld [vmem:[%s3289_s8 + $0x58] sm:$0xff]   ;;  %v2242_v2 = vld [vmem:[%s3293_s12] ss:$0 sm:$0xff] }
 0x17a   : > { %833 = vmatmul.mubr.bf16.vlgmr.msra.gmra.mxu1 %v710_v7  ;;  %966 = vmatmul.mubr.bf16.vlgmr.msra.gmra.mxu0 %v710_v7 }
 0x17b   : > { %2445 = vmatprep.mubr.msk.bf16.mxu1 %vm2688_vm1, %v2687_v1  ;;  %2453 = vmatprep.mubr.msk.bf16.mxu0 %vm2688_vm1, %v2687_v1 }
 0x17c   : > { %2450 = vmatpush3.bf16.msra.mxu0 %v2572_v8  ;;  %2442 = vmatpush3.bf16.msra.mxu1 %v2573_v9 }
 0x17d   : > { %2451 = vmatprep.subr.bf16.mxu0 %v2687_v1  ;;  %2443 = vmatprep.subr.bf16.mxu1 %v2687_v1 }
 0x180   : > { %2452 = vmatpush3.bf16.msra.mxu0 %v2574_v10  ;;  %2444 = vmatpush3.bf16.msra.mxu1 %v2575_v11 }
 0x181   : > { %1263 = vmatprep.subr.bf16.mxu1 %v2689_v6  ;;  %1397 = vmatprep.subr.bf16.mxu0 %v2689_v6 }
 0x23a   : > { %v834_v13 = vpop.f32.mrf.mxu1  ;;  %v967_v14 = vpop.f32.mrf.mxu0 }
 0x23b   : > { %v968_v16 = vadd.f32 %v2223_v12, %v967_v14  ;;  %v835_v32 = vadd.f32 %v2210_v29, %v834_v13 }
 0x23c   : > { %v836_v17 = vpop.f32.mrf.mxu1  ;;  %v969_v18 = vpop.f32.mrf.mxu0 }
 0x23d   : > { %v979_v19 = vadd.f32 %v2235_v15, %v968_v16  ;;  %v846_v37 = vadd.f32 %v2222_v33, %v835_v32  ;;  %v2593_v18 = vld [vmem:[%s3289_s8 + $0x98] sm:$0xff]  }
 0x23e   : > { %v837_v20 = vpop.f32.mrf.mxu1  ;;  %v970_v21 = vpop.f32.mrf.mxu0 }
 0x23f   : > { %v2236_v22 = vmul.f32 -1.442695, %v979_v19  ;;  %v971_v23 = vadd.f32 %v2223_v12, %v970_v21  ;;  %v838_v34 = vadd.f32 %v2210_v29, %v837_v20  ;;  %v2595_v19 = vld [vmem:[%s3289_s8 + $0x90] sm:$0xff]  }
 0x240   : > { %v839_v24 = vpop.f32.mrf.mxu1  ;;  %v972_v25 = vpop.f32.mrf.mxu0 }
 0x241   : > { %2624 = vpow2.f32 %v2236_v22  ;;  %v980_v27 = vadd.f32 %v2235_v15, %v971_v23  ;;  %v847_v39 = vadd.f32 %v2222_v33, %v838_v34 }
 0x243   : > { %v2237_v28 = vmul.f32 -1.442695, %v980_v27 }
 0x245   : > { %2626 = vpow2.f32 %v2237_v28 }
 0x246   : > { %2628 = vtanh.f32 %v846_v37 }
 0x24e   : > { %v2625_v36 = vpop.eup %2624 }
 0x24f   : > { %v989_v38 = vadd.f32 1.0, %v2625_v36 }
 0x251   : > { %2630 = vrcp.f32 %v989_v38 }
 0x252   : > { %v2627_v40 = vpop.eup %2626  ;;  %2632 = vtanh.f32 %v847_v39 }
 0x253   : > { %v990_v41 = vadd.f32 1.0, %v2627_v40  ;;  %v2629_v42 = vpop.eup %2628 }
 0x255   : > { %2634 = vrcp.f32 %v990_v41 }
 0x25e   : > { %v2631_v43 = vpop.eup %2630 }
 0x25f   : > { %v2633_v44 = vpop.eup %2632  ;;  %v995_v46 = vmul.f32 %v2631_v43, %v2629_v42 }
 0x262   : > { %v2635_v45 = vpop.eup %2634 }
 0x263   : > { %v996_v47 = vmul.f32 %v2635_v45, %v2633_v44 }
 0x265   : > { %v997_v48 = vpack.c.bf16 %v996_v47, %v995_v46 }
 0x267   : > { %2446 = vmatmul.mubr.msk.bf16.vlgmr.msra.gmra.mxu1 %vm661_vm3, %v997_v48  ;;  %2454 = vmatmul.mubr.msk.bf16.vlgmr.msra.gmra.mxu0 %vm661_vm3, %v997_v48 }
 0x268   : > { %1264 = vmatpush1.bf16.msra.mxu1 %v2576_v49  ;;  %1398 = vmatpush1.bf16.msra.mxu0 %v2577_v50 }
 0x269   : > { %1265 = vmatprep.subr.bf16.mxu1 %v2689_v6  ;;  %1399 = vmatprep.subr.bf16.mxu0 %v2689_v6 }
 0x26c   : > { %1266 = vmatpush1.bf16.msra.mxu1 %v2578_v51  ;;  %1400 = vmatpush1.bf16.msra.mxu0 %v2579_v52 }
 0x26d   : > { %1267 = vmatprep.subr.bf16.mxu1 %v2689_v6  ;;  %1401 = vmatprep.subr.bf16.mxu0 %v2689_v6 }
 0x270   : > { %1268 = vmatpush1.bf16.msra.mxu1 %v2580_v53  ;;  %1402 = vmatpush1.bf16.msra.mxu0 %v2581_v54  ;;  %v2596_v53 = vld [vmem:[%s3292_s11 + $0x18] sm:$0xff]  }
 0x271   : > { %1269 = vmatprep.subr.bf16.mxu1 %v2689_v6  ;;  %1403 = vmatprep.subr.bf16.mxu0 %v2689_v6  ;;  %v2597_v54 = vld [vmem:[%s3294_s13 + $0x18] sm:$0xff]  }
 0x274   : > { %1270 = vmatpush1.bf16.msra.mxu1 %v2582_v55  ;;  %1404 = vmatpush1.bf16.msra.mxu0 %v2583_v56  ;;  %v2598_v55 = vld [vmem:[%s3292_s11 + $0x10] sm:$0xff]  }
 0x275   : > { %1271 = vmatprep.subr.bf16.mxu1 %v2689_v6  ;;  %1405 = vmatprep.subr.bf16.mxu0 %v2689_v6  ;;  %v2599_v56 = vld [vmem:[%s3294_s13 + $0x10] sm:$0xff]  }
 0x278   : > { %1272 = vmatpush1.bf16.msra.mxu1 %v2584_v57  ;;  %1406 = vmatpush1.bf16.msra.mxu0 %v2585_v58  ;;  %v2299_v57 = vld [vmem:[%s3291_s10 + $0x1] ss:$0 sm:$0xff] }
 0x279   : > { %1273 = vmatprep.subr.bf16.mxu1 %v2689_v6  ;;  %1407 = vmatprep.subr.bf16.mxu0 %v2689_v6 }
 0x27c   : > { %1274 = vmatpush1.bf16.msra.mxu1 %v2586_v59  ;;  %1408 = vmatpush1.bf16.msra.mxu0 %v2587_v60  ;;  %v2311_v60 = vld [vmem:[%s2958_s4 + $0x1] ss:$0 sm:$0xff] }
 0x27d   : > { %1275 = vmatprep.subr.bf16.mxu1 %v2689_v6  ;;  %1409 = vmatprep.subr.bf16.mxu0 %v2689_v6 }
 0x280   : > { %1276 = vmatpush1.bf16.msra.mxu1 %v2588_v61  ;;  %1410 = vmatpush1.bf16.msra.mxu0 %v2589_v62 }
 0x281   : > { %1277 = vmatprep.subr.bf16.mxu1 %v2689_v6  ;;  %1411 = vmatprep.subr.bf16.mxu0 %v2689_v6 }
 0x284   : > { %1278 = vmatpush1.bf16.msra.mxu1 %v2590_v63  ;;  %1412 = vmatpush1.bf16.msra.mxu0 %v2591_v0 }
 0x285   : > { %1291 = vmatprep.subr.bf16.mxu1 %v2689_v6  ;;  %1425 = vmatprep.subr.bf16.mxu0 %v2689_v6 }
 0x288   : > { %1426 = vmatpush2.bf16.msra.mxu0 %v2593_v18 }
 0x289   : > { %1427 = vmatprep.subr.bf16.mxu0 %v2689_v6 }
 0x28c   : > { %1428 = vmatpush2.bf16.msra.mxu0 %v2595_v19 }
 0x28d   : > { %2465 = vmatprep.subr.bf16.mxu0 %v2687_v1 }
 0x327   : > { %v3042_v3 = vpop.f32.mrf.mxu1  ;;  %v1120_v4 = vpop.f32.mrf.mxu0 }
 0x328   : > { %v1121_v5 = vadd.f32 %v2242_v2, %v1120_v4 }
 0x329   : > { %v2447_v7 = vpop.f32.mrf.mxu1  ;;  %v2455_v8 = vpop.f32.mrf.mxu0 }
 0x32a   : > { %v1127_v9 = vadd.f32 %v1121_v5, %v2895_v30  ;;  %v2592_v30 = vld [vmem:[%s3288_s7 + $0x98] sm:$0xff]  }
 0x32b   : > { %v3045_v10 = vpop.f32.mrf.mxu1  ;;  %v1123_v11 = vpop.f32.mrf.mxu0  ;;  %1292 = vmatpush2.bf16.msra.mxu1 %v2592_v30 }
 0x32c   : > { %v3048_v12 = vmul.f32 %v2892_v26, %v1127_v9  ;;  %v1124_v13 = vadd.f32 %v2242_v2, %v1123_v11  ;;  %1293 = vmatprep.subr.bf16.mxu1 %v2689_v6 }
 0x32d   : > { %v2448_v14 = vpop.f32.mrf.mxu1  ;;  %v2456_v15 = vpop.f32.mrf.mxu0 }
 0x32e   : > { %1131 = vst.msk [vmem:[#allocation2 + $0x8] sm:$0xff] %vm661_vm3, %v3048_v12  ;;  %v1128_v16 = vadd.f32 %v1124_v13, %v2903_v35  ;;  %v2594_v35 = vld [vmem:[%s3288_s7 + $0x90] sm:$0xff]   ;;  %v2266_v14 = vld [vmem:[%s3290_s9 + $0x1] ss:$0 sm:$0xff] }
 0x32f   : > { %1294 = vmatpush2.bf16.msra.mxu1 %v2594_v35 }
 0x330   : > { %v3054_v17 = vmul.f32 %v2898_v31, %v1128_v16  ;;  %2457 = vmatprep.subr.bf16.mxu1 %v2687_v1  ;;  %v2278_v16 = vld [vmem:[%s2970_s22 + $0x1] ss:$0 sm:$0xff] }
 0x332   : > { %1132 = vst.msk [vmem:[#allocation2 + $0x10] sm:$0xff] %vm661_vm3, %v3054_v17 }
 0x335   : > { %v1137_v20 = vld [vmem:[#allocation2 + $0x8] sm:$0xff] }
 0x336   : > { %v1135_v21 = vld [vmem:[#allocation2 + $0x6] sm:$0xff] }
 0x337   : > { %v1133_v42 = vld [vmem:[#allocation2 + $0x4] sm:$0xff] }
 0x339   : > { %v1138_v22 = vld [vmem:[#allocation2 + $0x10] sm:$0xff] }
 0x33a   : > { %v1136_v23 = vld [vmem:[#allocation2 + $0xe] sm:$0xff]  ;;  %v2526_v25 = vpack.i.bf16 %v1138_v22, %v1137_v20 }
 0x33b   : > { %v1134_v24 = vld [vmem:[#allocation2 + $0xc] sm:$0xff]  ;;  %v2521_v27 = vpack.i.bf16 %v1136_v23, %v1135_v21  ;;  %v1141_v28 = vld [vmem:[#allocation2 + $0x14] sm:$0xff] }
 0x33c   : > { %v1173_v29 = vpack.c.bf16 %v1141_v28, %v1134_v24  ;;  %v1139_v32 = vld [vmem:[#allocation2 + $0xa] sm:$0xff]  ;;  %v1140_v33 = vld [vmem:[#allocation2 + $0x12] sm:$0xff]  ;;  %2527 = vrot.lane.b32.xlu0 %v2526_v25, %s2692_s28 }
 0x33d   : > { %2522 = vrot.lane.b32.xlu1 %v2521_v27, %s2691_s27  ;;  %v2531_v34 = vpack.i.bf16 %v1140_v33, %v1139_v32  ;;  %v2600_v33 = vld [vmem:[%s3288_s7 + $0xd8] sm:$0xff]  }
 0x33e   : > { %2277 = vmatprep.mubr.msk.bf16.mxu1 %vm661_vm3, %v1173_v29  ;;  %2310 = vmatprep.mubr.msk.bf16.mxu0 %vm661_vm3, %v1173_v29 }
 0x341   : > { %2532 = vrot.lane.b32.xlu1 %v2531_v34, %s2690_s26  ;;  %v2601_v34 = vld [vmem:[%s3289_s8 + $0xd8] sm:$0xff]  }
 0x3ae   : > { %v2528_v36 = vpop.permute.xlu0 %2527 }
 0x3af   : > { %v2523_v37 = vpop.permute.xlu1 %2522  ;;  %v2530_v40 = vunpack.i.h.bf16 %v2528_v36  ;;  %v2529_v41 = vunpack.i.l.bf16 %v2528_v36  ;;  %v2602_v36 = vld [vmem:[%s3288_s7 + $0xd0] sm:$0xff]  }
 0x3b0   : > { %v2525_v38 = vunpack.i.h.bf16 %v2523_v37  ;;  %v2524_v39 = vunpack.i.l.bf16 %v2523_v37  ;;  %v2603_v37 = vld [vmem:[%s3289_s8 + $0xd0] sm:$0xff]  }
 0x3b2   : > { %v1166_v43 = vsel %vm661_vm3, %v1133_v42, %v2524_v39  ;;  %v1167_v44 = vsel %vm661_vm3, %v1134_v24, %v2525_v38  ;;  %v2604_v38 = vld [vmem:[%s3288_s7 + $0xc8] sm:$0xff]   ;;  %v2608_v42 = vld [vmem:[%s3288_s7 + $0xb8] sm:$0xff]  }
 0x3b3   : > { %v2533_v45 = vpop.permute.xlu1 %2532  ;;  %v1168_v48 = vsel %vm704_vm6, %v1166_v43, %v2529_v41  ;;  %v1169_v49 = vsel %vm704_vm6, %v1167_v44, %v2530_v40  ;;  %v2605_v39 = vld [vmem:[%s3289_s8 + $0xc8] sm:$0xff]   ;;  %v2606_v40 = vld [vmem:[%s3288_s7 + $0xc0] sm:$0xff]   ;;  %v2609_v43 = vld [vmem:[%s3289_s8 + $0xb8] sm:$0xff]  }
 0x3b4   : > { %v2535_v46 = vunpack.i.h.bf16 %v2533_v45  ;;  %v2534_v47 = vunpack.i.l.bf16 %v2533_v45  ;;  %v2607_v41 = vld [vmem:[%s3289_s8 + $0xc0] sm:$0xff]   ;;  %v2610_v44 = vld [vmem:[%s3288_s7 + $0xb0] sm:$0xff]  }
 0x3b5   : > { %v2611_v45 = vld [vmem:[%s3289_s8 + $0xb0] sm:$0xff]  }
 0x3b6   : > { %v1170_v50 = vsel %vm707_vm7, %v1168_v48, %v2534_v47  ;;  %v1171_v51 = vsel %vm707_vm7, %v1169_v49, %v2535_v46  ;;  %v2612_v46 = vld [vmem:[%s3288_s7 + $0xa8] sm:$0xff]   ;;  %v2614_v48 = vld [vmem:[%s3288_s7 + $0xa0] sm:$0xff]  }
 0x3b7   : > { %v1172_v52 = vpack.c.bf16 %v1171_v51, %v1170_v50  ;;  %v2613_v47 = vld [vmem:[%s3289_s8 + $0xa8] sm:$0xff]   ;;  %v2615_v49 = vld [vmem:[%s3289_s8 + $0xa0] sm:$0xff]  }
 0x3b8   : > { %v2238_v50 = vld [vmem:[%s3295_s14] ss:$0 sm:$0xff]  ;;  %v2318_v51 = vld [vmem:[%s3295_s14 + $0x1] ss:$0 sm:$0xff] }
 0x3b9   : > { %1296 = vmatmul.mubr.bf16.vlgmr.msra.gmra.mxu1 %v1172_v52  ;;  %1430 = vmatmul.mubr.bf16.vlgmr.msra.gmra.mxu0 %v1172_v52  ;;  %v2326_v52 = vld [vmem:[%s3293_s12 + $0x1] ss:$0 sm:$0xff] }
 0x3ba   : > { %2461 = vmatprep.mubr.msk.bf16.mxu1 %vm2688_vm1, %v2687_v1  ;;  %2469 = vmatprep.mubr.msk.bf16.mxu0 %vm2688_vm1, %v2687_v1 }
 0x3bb   : > { %2466 = vmatpush3.bf16.msra.mxu0 %v2596_v53  ;;  %2458 = vmatpush3.bf16.msra.mxu1 %v2597_v54 }
 0x3bc   : > { %2467 = vmatprep.subr.bf16.mxu0 %v2687_v1  ;;  %2459 = vmatprep.subr.bf16.mxu1 %v2687_v1 }
 0x3bf   : > { %2468 = vmatpush3.bf16.msra.mxu0 %v2598_v55  ;;  %2460 = vmatpush3.bf16.msra.mxu1 %v2599_v56  ;;  %v1057_v55 = vadd.f32 %v2238_v50, %v3042_v3 }
 0x3c0   : > { %1726 = vmatprep.subr.bf16.mxu1 %v2689_v6  ;;  %1860 = vmatprep.subr.bf16.mxu0 %v2689_v6 }
 0x479   : > { %v1297_v58 = vpop.f32.mrf.mxu1  ;;  %v1431_v59 = vpop.f32.mrf.mxu0 }
 0x47a   : > { %v1432_v61 = vadd.f32 %v2299_v57, %v1431_v59  ;;  %v1298_v15 = vadd.f32 %v2266_v14, %v1297_v58 }
 0x47b   : > { %v1299_v62 = vpop.f32.mrf.mxu1  ;;  %v1433_v63 = vpop.f32.mrf.mxu0 }
 0x47c   : > { %v1443_v0 = vadd.f32 %v2311_v60, %v1432_v61  ;;  %v1309_v35 = vadd.f32 %v2278_v16, %v1298_v15 }
 0x47d   : > { %v1300_v2 = vpop.f32.mrf.mxu1  ;;  %v1434_v4 = vpop.f32.mrf.mxu0 }
 0x47e   : > { %v2312_v5 = vmul.f32 -1.442695, %v1443_v0  ;;  %v1435_v7 = vadd.f32 %v2299_v57, %v1434_v4  ;;  %v1301_v30 = vadd.f32 %v2266_v14, %v1300_v2  ;;  %v1060_v0 = vadd.f32 %v2238_v50, %v3045_v10  ;;  %v2617_v10 = vld [vmem:[%s3289_s8 + $0xe8] sm:$0xff]   ;;  %v1605_v14 = vld [vmem:[#allocation2 + $0x18] sm:$0xff] }
 0x47f   : > { %v1302_v8 = vpop.f32.mrf.mxu1  ;;  %v1436_v9 = vpop.f32.mrf.mxu0 }
 0x480   : > { %2636 = vpow2.f32 %v2312_v5  ;;  %v1444_v11 = vadd.f32 %v2311_v60, %v1435_v7  ;;  %v1310_v20 = vadd.f32 %v2278_v16, %v1301_v30 }
 0x482   : > { %v2313_v13 = vmul.f32 -1.442695, %v1444_v11 }
 0x484   : > { %2638 = vpow2.f32 %v2313_v13  ;;  %v2619_v13 = vld [vmem:[%s3289_s8 + $0xe0] sm:$0xff]  }
 0x485   : > { %2640 = vtanh.f32 %v1309_v35 }
 0x48d   : > { %v2637_v18 = vpop.eup %2636 }
 0x48e   : > { %v1453_v19 = vadd.f32 1.0, %v2637_v18 }
 0x490   : > { %2642 = vrcp.f32 %v1453_v19 }
 0x491   : > { %v2639_v21 = vpop.eup %2638  ;;  %2644 = vtanh.f32 %v1310_v20 }
 0x492   : > { %v1454_v22 = vadd.f32 1.0, %v2639_v21  ;;  %v2641_v23 = vpop.eup %2640 }
 0x494   : > { %2646 = vrcp.f32 %v1454_v22 }
 0x49d   : > { %v2643_v24 = vpop.eup %2642 }
 0x49e   : > { %v2645_v25 = vpop.eup %2644  ;;  %v1459_v28 = vmul.f32 %v2643_v24, %v2641_v23  ;;  %v1599_v23 = vld [vmem:[#allocation2] sm:$0xff] }
 0x4a1   : > { %v2647_v27 = vpop.eup %2646 }
 0x4a2   : > { %v1460_v29 = vmul.f32 %v2647_v27, %v2645_v25 }
 0x4a4   : > { %v1461_v32 = vpack.c.bf16 %v1460_v29, %v1459_v28 }
 0x4a6   : > { %2462 = vmatmul.mubr.msk.bf16.vlgmr.msra.gmra.mxu1 %vm661_vm3, %v1461_v32  ;;  %2470 = vmatmul.mubr.msk.bf16.vlgmr.msra.gmra.mxu0 %vm661_vm3, %v1461_v32 }
 0x4a7   : > { %1727 = vmatpush1.bf16.msra.mxu1 %v2600_v33  ;;  %1861 = vmatpush1.bf16.msra.mxu0 %v2601_v34 }
 0x4a8   : > { %1728 = vmatprep.subr.bf16.mxu1 %v2689_v6  ;;  %1862 = vmatprep.subr.bf16.mxu0 %v2689_v6 }
 0x4ab   : > { %1729 = vmatpush1.bf16.msra.mxu1 %v2602_v36  ;;  %1863 = vmatpush1.bf16.msra.mxu0 %v2603_v37 }
 0x4ac   : > { %1730 = vmatprep.subr.bf16.mxu1 %v2689_v6  ;;  %1864 = vmatprep.subr.bf16.mxu0 %v2689_v6 }
 0x4af   : > { %1731 = vmatpush1.bf16.msra.mxu1 %v2604_v38  ;;  %1865 = vmatpush1.bf16.msra.mxu0 %v2605_v39 }
 0x4b0   : > { %1732 = vmatprep.subr.bf16.mxu1 %v2689_v6  ;;  %1866 = vmatprep.subr.bf16.mxu0 %v2689_v6 }
 0x4b3   : > { %1733 = vmatpush1.bf16.msra.mxu1 %v2606_v40  ;;  %1867 = vmatpush1.bf16.msra.mxu0 %v2607_v41 }
 0x4b4   : > { %1734 = vmatprep.subr.bf16.mxu1 %v2689_v6  ;;  %1868 = vmatprep.subr.bf16.mxu0 %v2689_v6 }
 0x4b7   : > { %1735 = vmatpush1.bf16.msra.mxu1 %v2608_v42  ;;  %1869 = vmatpush1.bf16.msra.mxu0 %v2609_v43  ;;  %v2620_v43 = vld [vmem:[%s3294_s13 + $0x28] sm:$0xff]  }
 0x4b8   : > { %1736 = vmatprep.subr.bf16.mxu1 %v2689_v6  ;;  %1870 = vmatprep.subr.bf16.mxu0 %v2689_v6 }
 0x4bb   : > { %1737 = vmatpush1.bf16.msra.mxu1 %v2610_v44  ;;  %1871 = vmatpush1.bf16.msra.mxu0 %v2611_v45  ;;  %v2621_v44 = vld [vmem:[%s3294_s13 + $0x20] sm:$0xff]  }
 0x4bc   : > { %1738 = vmatprep.subr.bf16.mxu1 %v2689_v6  ;;  %1872 = vmatprep.subr.bf16.mxu0 %v2689_v6  ;;  %v2383_v45 = vld [vmem:[%s3291_s10 + $0x2] ss:$0 sm:$0xff] }
 0x4bf   : > { %1739 = vmatpush1.bf16.msra.mxu1 %v2612_v46  ;;  %1873 = vmatpush1.bf16.msra.mxu0 %v2613_v47 }
 0x4c0   : > { %1740 = vmatprep.subr.bf16.mxu1 %v2689_v6  ;;  %1874 = vmatprep.subr.bf16.mxu0 %v2689_v6 }
 0x4c3   : > { %1741 = vmatpush1.bf16.msra.mxu1 %v2614_v48  ;;  %1875 = vmatpush1.bf16.msra.mxu0 %v2615_v49  ;;  %v2395_v48 = vld [vmem:[%s2958_s4 + $0x2] ss:$0 sm:$0xff]  ;;  %s577_s4 = scalar_lea.vmem %s3304_s0, %s2413_s25 }
 0x4c4   : > { %1754 = vmatprep.subr.bf16.mxu1 %v2689_v6  ;;  %1888 = vmatprep.subr.bf16.mxu0 %v2689_v6 }
 0x4c7   : > { %1889 = vmatpush2.bf16.msra.mxu0 %v2617_v10 }
 0x4c8   : > { %1890 = vmatprep.subr.bf16.mxu0 %v2689_v6 }
 0x4cb   : > { %1891 = vmatpush2.bf16.msra.mxu0 %v2619_v13 }
 0x4cc   : > { %2481 = vmatprep.subr.bf16.mxu0 %v2687_v1 }
 0x566   : > { %v1521_v53 = vpop.f32.mrf.mxu1  ;;  %v1586_v54 = vpop.f32.mrf.mxu0 }
 0x567   : > { %v1522_v56 = vadd.f32 %v2318_v51, %v1521_v53  ;;  %v1587_v57 = vadd.f32 %v2326_v52, %v1586_v54 }
 0x568   : > { %v2463_v58 = vpop.f32.mrf.mxu1  ;;  %v2471_v59 = vpop.f32.mrf.mxu0 }
 0x569   : > { %v3189_v60 = vadd.f32 %v1522_v56, %v1057_v55  ;;  %v1593_v61 = vadd.f32 %v1587_v57, %v3048_v12  ;;  %v2616_v12 = vld [vmem:[%s3288_s7 + $0xe8] sm:$0xff]  }
 0x56a   : > { %v1524_v62 = vpop.f32.mrf.mxu1  ;;  %v1589_v63 = vpop.f32.mrf.mxu0  ;;  %1755 = vmatpush2.bf16.msra.mxu1 %v2616_v12 }
 0x56b   : > { %v1595_v2 = vmul.f32 %v2892_v26, %v1593_v61  ;;  %v1525_v4 = vadd.f32 %v2318_v51, %v1524_v62  ;;  %v1590_v5 = vadd.f32 %v2326_v52, %v1589_v63  ;;  %1756 = vmatprep.subr.bf16.mxu1 %v2689_v6  ;;  %v2350_v62 = vld [vmem:[%s3290_s9 + $0x2] ss:$0 sm:$0xff] }
 0x56c   : > { %v2464_v7 = vpop.f32.mrf.mxu1  ;;  %v2472_v8 = vpop.f32.mrf.mxu0 }
 0x56d   : > { %1597 = vst.msk [vmem:[#allocation2 + $0x8] sm:$0xff] %vm661_vm3, %v1595_v2  ;;  %v3195_v3 = vadd.f32 %v1525_v4, %v1060_v0  ;;  %v1594_v9 = vadd.f32 %v1590_v5, %v3054_v17  ;;  %v2618_v17 = vld [vmem:[%s3288_s7 + $0xe0] sm:$0xff]  }
 0x56e   : > { %1757 = vmatpush2.bf16.msra.mxu1 %v2618_v17  ;;  %v2362_v0 = vld [vmem:[%s2970_s22 + $0x2] ss:$0 sm:$0xff] }
 0x56f   : > { %v1596_v11 = vmul.f32 %v2898_v31, %v1594_v9  ;;  %2473 = vmatprep.subr.bf16.mxu1 %v2687_v1 }
 0x571   : > { %1598 = vst.msk [vmem:[#allocation2 + $0x10] sm:$0xff] %vm661_vm3, %v1596_v11 }
 0x574   : > { %v1600_v15 = vld [vmem:[#allocation2 + $0x8] sm:$0xff] }
 0x575   : > { %v1601_v30 = vld [vmem:[#allocation2 + $0x4] sm:$0xff] }
 0x578   : > { %v1603_v16 = vld [vmem:[#allocation2 + $0x10] sm:$0xff] }
 0x579   : > { %v1602_v18 = vld [vmem:[#allocation2 + $0xc] sm:$0xff]  ;;  %v2541_v6 = vpack.i.bf16 %v1603_v16, %v1600_v15  ;;  %v1636_v35 = vpack.c.bf16 %v1605_v14, %v1603_v16  ;;  %v1604_v20 = vld [vmem:[#allocation2 + $0x14] sm:$0xff] }
 0x57a   : > { %v2536_v19 = vpack.i.bf16 %v1602_v18, %v1601_v30  ;;  %v2546_v21 = vpack.i.bf16 %v1604_v20, %v1602_v18  ;;  %v2622_v30 = vld [vmem:[%s3296_s15 + $0x8] sm:$0xff]   ;;  %v2623_v18 = vld [vmem:[%s3296_s15] sm:$0xff]  }
 0x57b   : > { %2542 = vrot.lane.b32.xlu1 %v2541_v6, %s2692_s28  ;;  %2394 = vmatprep.mubr.msk.bf16.mxu0 %vm661_vm3, %v1636_v35  ;;  %v2402_v6 = vld [vmem:[%s3295_s14 + $0x2] ss:$0 sm:$0xff]  ;;  %s2693_s28 = smov 124  }
 0x57c   : > { %2537 = vrot.lane.b32.xlu0 %v2536_v19, %s2691_s27  ;;  %2361 = vmatprep.mubr.msk.bf16.mxu1 %vm661_vm3, %v1636_v35 }
 0x580   : > { %2547 = vrot.lane.b32.xlu0 %v2546_v21, %s2690_s26 }
 0x5ed   : > { %v2543_v22 = vpop.permute.xlu1 %2542 }
 0x5ee   : > { %v2538_v24 = vpop.permute.xlu0 %2537  ;;  %v2545_v28 = vunpack.i.h.bf16 %v2543_v22  ;;  %v2544_v29 = vunpack.i.l.bf16 %v2543_v22 }
 0x5ef   : > { %v2540_v25 = vunpack.i.h.bf16 %v2538_v24  ;;  %v2539_v27 = vunpack.i.l.bf16 %v2538_v24 }
 0x5f1   : > { %v1630_v32 = vsel %vm661_vm3, %v1600_v15, %v2540_v25  ;;  %v1629_v33 = vsel %vm661_vm3, %v1599_v23, %v2539_v27 }
 0x5f2   : > { %v2548_v34 = vpop.permute.xlu0 %2547  ;;  %v1631_v38 = vsel %vm704_vm6, %v1629_v33, %v2544_v29  ;;  %v1632_v39 = vsel %vm704_vm6, %v1630_v32, %v2545_v28  ;;  %v2406_v29 = vld [vmem:[%s3297_s16] ss:$0 sm:$0xff] }
 0x5f3   : > { %v2550_v36 = vunpack.i.h.bf16 %v2548_v34  ;;  %v2549_v37 = vunpack.i.l.bf16 %v2548_v34 }
 0x5f5   : > { %v1633_v40 = vsel %vm707_vm7, %v1631_v38, %v2549_v37  ;;  %v1634_v41 = vsel %vm707_vm7, %v1632_v39, %v2550_v36 }
 0x5f6   : > { %v1635_v42 = vpack.c.bf16 %v1634_v41, %v1633_v40 }
 0x5f8   : > { %1759 = vmatmul.mubr.bf16.vlgmr.msra.gmra.mxu1 %v1635_v42  ;;  %1893 = vmatmul.mubr.bf16.vlgmr.msra.gmra.mxu0 %v1635_v42 }
 0x5f9   : > { %2477 = vmatprep.mubr.msk.bf16.mxu1 %vm2688_vm1, %v2687_v1  ;;  %2485 = vmatprep.mubr.msk.bf16.mxu0 %vm2688_vm1, %v2687_v1 }
 0x5fa   : > { %2474 = vmatpush3.bf16.msra.mxu1 %v2620_v43  ;;  %2482 = vmatpush3.bf16.msra.mxu0 %v2622_v30  ;;  %v2065_v43 = vld [vmem:[%s577_s4] sm:$0xff] }
 0x5fb   : > { %2475 = vmatprep.subr.bf16.mxu1 %v2687_v1  ;;  %2483 = vmatprep.subr.bf16.mxu0 %v2687_v1 }
 0x5fe   : > { %2476 = vmatpush3.bf16.msra.mxu1 %v2621_v44  ;;  %2484 = vmatpush3.bf16.msra.mxu0 %v2623_v18 }
 0x6b8   : > { %v1760_v46 = vpop.f32.mrf.mxu1  ;;  %v1894_v47 = vpop.f32.mrf.mxu0 }
 0x6b9   : > { %v1895_v49 = vadd.f32 %v2383_v45, %v1894_v47  ;;  %v1761_v63 = vadd.f32 %v2350_v62, %v1760_v46  ;;  %v2066_v46 = vld [vmem:[%s577_s4 + $0x8] sm:$0xff] }
 0x6ba   : > { %v1762_v50 = vpop.f32.mrf.mxu1  ;;  %v1896_v51 = vpop.f32.mrf.mxu0 }
 0x6bb   : > { %v1906_v52 = vadd.f32 %v2395_v48, %v1895_v49  ;;  %v1772_v5 = vadd.f32 %v2362_v0, %v1761_v63 }
 0x6bc   : > { %v1763_v53 = vpop.f32.mrf.mxu1  ;;  %v1897_v54 = vpop.f32.mrf.mxu0 }
 0x6bd   : > { %v2396_v55 = vmul.f32 -1.442695, %v1906_v52  ;;  %v1898_v56 = vadd.f32 %v2383_v45, %v1897_v54  ;;  %v1764_v2 = vadd.f32 %v2350_v62, %v1763_v53 }
 0x6be   : > { %v1765_v57 = vpop.f32.mrf.mxu1  ;;  %v1899_v58 = vpop.f32.mrf.mxu0 }
 0x6bf   : > { %2648 = vpow2.f32 %v2396_v55  ;;  %v1907_v59 = vadd.f32 %v2395_v48, %v1898_v56  ;;  %v1773_v8 = vadd.f32 %v2362_v0, %v1764_v2 }
 0x6c1   : > { %v2397_v61 = vmul.f32 -1.442695, %v1907_v59 }
 0x6c3   : > { %2650 = vpow2.f32 %v2397_v61 }
 0x6c4   : > { %2652 = vtanh.f32 %v1772_v5 }
 0x6cc   : > { %v2649_v4 = vpop.eup %2648 }
 0x6cd   : > { %v1916_v7 = vadd.f32 1.0, %v2649_v4 }
 0x6cf   : > { %2654 = vrcp.f32 %v1916_v7 }
 0x6d0   : > { %v2651_v9 = vpop.eup %2650  ;;  %2656 = vtanh.f32 %v1773_v8 }
 0x6d1   : > { %v1917_v11 = vadd.f32 1.0, %v2651_v9  ;;  %v2653_v12 = vpop.eup %2652 }
 0x6d3   : > { %2658 = vrcp.f32 %v1917_v11 }
 0x6dc   : > { %v2655_v10 = vpop.eup %2654 }
 0x6dd   : > { %v2657_v17 = vpop.eup %2656  ;;  %v1922_v14 = vmul.f32 %v2655_v10, %v2653_v12 }
 0x6e0   : > { %v2659_v13 = vpop.eup %2658 }
 0x6e1   : > { %v1923_v15 = vmul.f32 %v2659_v13, %v2657_v17 }
 0x6e3   : > { %v1924_v16 = vpack.c.bf16 %v1923_v15, %v1922_v14 }
 0x6e5   : > { %2478 = vmatmul.mubr.msk.bf16.vlgmr.msra.gmra.mxu1 %vm661_vm3, %v1924_v16 }
 0x7a5   : > { %v1984_v35 = vpop.f32.mrf.mxu1 }
 0x7a6   : > { %v1985_v19 = vadd.f32 %v2402_v6, %v1984_v35 }
 0x7a7   : > { %v2479_v20 = vpop.f32.mrf.mxu1 }
 0x7a8   : > { %v1991_v22 = vadd.f32 %v1985_v19, %v3189_v60 }
 0x7a9   : > { %v1987_v21 = vpop.f32.mrf.mxu1 }
 0x7aa   : > { %v1988_v23 = vadd.f32 %v2402_v6, %v1987_v21  ;;  %v1993_v1 = vmul.f32 %v2892_v26, %v1991_v22 }
 0x7ab   : > { %v2480_v24 = vpop.f32.mrf.mxu1 }
 0x7ac   : > { %v1992_v25 = vadd.f32 %v1988_v23, %v3195_v3 }
 0x7ae   : > { %v1994_v27 = vmul.f32 %v2898_v31, %v1992_v25 }
 0x7b0   : > { %v1995_v28 = vpack.c.bf16 %v1994_v27, %v1993_v1 }
 0x7b2   : > { %2486 = vmatmul.mubr.msk.bf16.vlgmr.msra.gmra.mxu0 %vm661_vm3, %v1995_v28 }
 0x872   : > { %v2056_v32 = vpop.f32.mrf.mxu0 }
 0x873   : > { %v2057_v33 = vadd.f32 %v2406_v29, %v2056_v32 }
 0x874   : > { %v2487_v34 = vpop.f32.mrf.mxu0 }
 0x875   : > { %v2063_v60 = vmul.f32 %v2892_v26, %v2057_v33 }
 0x876   : > { %v2059_v36 = vpop.f32.mrf.mxu0 }
 0x877   : > { %v2067_v37 = vmul.f32 1.442695, %v2063_v60  ;;  %v2060_v3 = vadd.f32 %v2406_v29, %v2059_v36 }
 0x878   : > { %v2488_v38 = vpop.f32.mrf.mxu0 }
 0x879   : > { %2660 = vpow2.f32 %v2067_v37  ;;  %v2064_v39 = vmul.f32 %v2898_v31, %v2060_v3 }
 0x87b   : > { %v2069_v40 = vmul.f32 1.442695, %v2064_v39 }
 0x87d   : > { %2662 = vpow2.f32 %v2069_v40 }
 0x886   : > { %v2661_v41 = vpop.eup %2660 }
 0x887   : > { %2073 = vrot.lane.b32.xlu1 %v2661_v41, %s2693_s28 }
 0x88a   : > { %v2663_v42 = vpop.eup %2662 }
 0x88b   : > { %2087 = vrot.lane.b32.xlu1 %v2063_v60, %s2694_s24  ;;  %2075 = vrot.lane.b32.xlu0 %v2663_v42, %s2693_s28 }
 0x88f   : > { %2089 = vrot.lane.b32.xlu0 %v2064_v39, %s2694_s24 }
 0x8f9   : > { %v2074_v44 = vpop.permute.xlu1 %2073 }
 0x8fa   : > { %v2079_v45 = vmul.f32 %v2074_v44, %v2065_v43 }
 0x8fc   : > { %v2081_v47 = vadd.f32 %v2079_v45, %v2063_v60 }
 0x8fd   : > { %v2076_v48 = vpop.permute.xlu0 %2075  ;;  %v2088_v51 = vpop.permute.xlu1 %2087 }
 0x8fe   : > { %v2083_v49 = vmul.f32 %v2892_v26, %v2081_v47  ;;  %v2080_v50 = vmul.f32 %v2076_v48, %v2066_v46 }
 0x900   : > { %v2094_v52 = vsel %vm2093_vm8, %v2083_v49, %v2088_v51  ;;  %v2082_v53 = vadd.f32 %v2080_v50, %v2064_v39 }
 0x901   : > { %v2096_v54 = vsel %vm610_vm2, %v2094_v52, %v2088_v51  ;;  %v2090_v56 = vpop.permute.xlu0 %2089 }
 0x902   : > { %2099 = vst.msk [vmem:[%s582_s20] sm:$0xff] %vm2098_vm9, %v2096_v54  ;;  %v2084_v55 = vmul.f32 %v2898_v31, %v2082_v53 }
 0x904   : > { %v2095_v57 = vsel %vm2093_vm8, %v2084_v55, %v2090_v56 }
 0x905   : > { %v2097_v58 = vsel %vm610_vm2, %v2095_v57, %v2090_v56 }
 0x906   : > { %2100 = vst.msk [vmem:[%s582_s20 + $0x8] sm:$0xff] %vm2098_vm9, %v2097_v58 }
 0x907 PF: > { %s33_s29 = sadd.s32 1, %s2684_s29  }
 0x908   : > { %p30_p9 = scmp.ge.s32.totalorder %s33_s29, 4  }
 0x90a   :  { %32 = sbr.rel (!%p30_p9) target bundleno = 25 (0x19), region = 130 }

</bundles_post_ra>
